<compile_context>
chip_gen: v6e
topology: v6e:2x2x1
jax: 0.10.0
libtpu: 0.0.40
codegen_flags: <defaults>
</compile_context>

<pallas_src>
import functools

import jax
import jax.numpy as jnp
from jax import lax
from jax.experimental import pallas as pl
from jax.experimental.pallas import tpu as pltpu


# ------------------------- static layer description --------------------------
# Each entry: (cout, cin, k, dilation, pad_left, use_mxu, is_basic, row_off, full_rows)
#   use_mxu   : big conv -> single folded matmul; else VPU broadcast FMAs
#   row_off   : row offset inside the packed (C, .) parameter slot
#   full_rows : kernel computes all C output rows (other rows are zero-padded
#               weights) so the two branch outputs can be summed instead of
#               concatenated -> single full-tile store.
def _layer_defs(C):
    h, q, e = C // 2, C // 4, C // 8
    return (
        (C, C, 1, 1, 0, True,  True,  0, False),   # stem.conv[0]  BasicConv1d(C, C, 1)
        (C, C, 3, 1, 1, True,  True,  0, False),   # stem.conv[1]  BasicConv1d(C, C, 3)
        (h, C, 3, 1, 1, True,  True,  0, False),   # branch_1[0]   BasicConv1d(C, C/2, 3)
        (h, h, 3, 1, 1, True,  True,  0, True),    # branch_1[1]   -> rows [0:C/2] of out tile
        (h, C, 1, 1, 0, True,  True,  0, False),   # branch_2[0]   BasicConv1d(C, C/2, 1)
        (q, h, 2, 1, 1, False, False, 0, False),   # TCN blk0 conv1 (k=2, d=1, causal)
        (q, q, 2, 1, 1, False, False, 0, False),   # TCN blk0 conv2
        (q, h, 1, 1, 0, False, False, 0, False),   # TCN blk0 downsample (1x1)
        (e, q, 2, 2, 2, False, False, 0, False),   # TCN blk1 conv1 (k=2, d=2, causal)
        (e, e, 2, 2, 2, False, False, 0, False),   # TCN blk1 conv2
        (e, q, 1, 1, 0, False, False, 0, False),   # TCN blk1 downsample (1x1)
        (h, e, 1, 1, 0, False, True,  h, True),    # branch_2[2]   -> rows [C/2:C] of out tile
    )


# ----------------------------- kernel helpers ------------------------------

def _shift(v, s, lane):
    """y[:, i] = v[:, i - s] (zero filled outside), s is a static python int.

    pltpu.roll goes to the XLU slot; the wrap-around lanes are zeroed with one
    VPU select against a precomputed lane iota.  No MXU work.
    """
    if s == 0:
        return v
    L = v.shape[-1]
    r = pltpu.roll(v, s % L, 1)
    if s > 0:
        return jnp.where(lane >= s, r, 0.0)
    return jnp.where(lane < L + s, r, 0.0)


def _conv_mxu(v, w2, b, k, cin, dilation, pad_left, lane):
    """Conv as a single MXU matmul with the K taps folded onto the contraction
    axis (when the tap stack is sublane-aligned), else K accumulated dots.

    v: (cin, L), w2: (rows, k*cin) with w2[:, t*cin + ci] = w[:, ci, t],
    b: (rows, 1).
    """
    taps = [_shift(v, pad_left - t * dilation, lane) for t in range(k)]
    if k == 1:
        return jnp.dot(w2, taps[0], preferred_element_type=jnp.float32) + b
    if cin % 8 == 0:  # sublane-aligned stack -> one big matmul
        vk = jnp.concatenate(taps, axis=0)                     # (k*cin, L)
        return jnp.dot(w2, vk, preferred_element_type=jnp.float32) + b
    acc = jnp.dot(w2[:, :cin], taps[0], preferred_element_type=jnp.float32)
    for t in range(1, k):
        acc = acc + jnp.dot(w2[:, t * cin:(t + 1) * cin], taps[t],
                            preferred_element_type=jnp.float32)
    return acc + b


def _conv_vpu(v, w2, b, k, cin, dilation, pad_left, lane):
    """Tiny conv (cin, cout <= C/2): broadcast multiply-adds on the VPU.

    out = sum_{t,ci} w2[:, t*cin+ci, None] * shift_t(v)[ci, None, :]  + b
    i.e. (rows,1) x (1,L) outer-product FMAs — no MXU push/pop latency.
    """
    acc = None
    for t in range(k):
        sv = _shift(v, pad_left - t * dilation, lane)
        for ci in range(cin):
            j = t * cin + ci
            term = w2[:, j:j + 1] * sv[ci:ci + 1, :]           # (rows, L)
            acc = term if acc is None else acc + term
    return acc + b


# --------------------------------- kernel -----------------------------------

def _stem_kernel(x_ref, wp_ref, bp_ref, o_ref, *, layers):
    _, C, L = x_ref.shape
    relu = lambda a: jnp.maximum(a, 0.0)
    hswish = lambda a: a * jnp.clip(a + 3.0, 0.0, 6.0) * (1.0 / 6.0)

    x = x_ref[0]                                          # (C, L) -- identity
    lane = lax.broadcasted_iota(jnp.int32, (1, L), 1)     # built once, reused by every shift

    def conv(i, v):
        cout, cin, k, dil, padl, mxu, _basic, _roff, full = layers[i]
        rows = C if full else cout
        w2 = wp_ref[i][:rows, :k * cin]                   # taps pre-folded host-side
        b = bp_ref[i][:rows]                              # (rows, 1)
        fn = _conv_mxu if mxu else _conv_vpu
        return fn(v, w2, b, k, cin, dil, padl, lane)

    # stem.conv: BasicConv1d(C,C,1) -> BasicConv1d(C,C,3), then hardswish
    out = relu(conv(0, x))
    out = hswish(relu(conv(1, out)))

    # branch_1: BasicConv1d(C,C/2,3) -> BasicConv1d(C/2,C/2,3)
    x1 = relu(conv(2, out))
    x1f = relu(conv(3, x1))          # (C, L): rows [0:C/2] real, rest exactly 0

    # branch_2: BasicConv1d(C,C/2,1) -> TCN([C/4, C/8]) -> BasicConv1d(C/8,C/2,1)
    x2 = relu(conv(4, out))
    h = relu(conv(5, x2))            # TCN block 0: C/2 -> C/4, k=2, d=1 (causal)
    h = relu(conv(6, h))
    x2 = relu(h + conv(7, x2))       # residual (1x1 downsample)
    h = relu(conv(8, x2))            # TCN block 1: C/4 -> C/8, k=2, d=2 (causal)
    h = relu(conv(9, h))
    x2 = relu(h + conv(10, x2))      # residual (1x1 downsample)
    x2f = relu(conv(11, x2))         # (C, L): rows [C/2:C] real, rest exactly 0

    # concat([x1, x2], channel)  ==  x1f + x2f  (disjoint non-zero rows)
    # -> eval-mode BN (scale/bias) -> hardswish -> + identity, ONE full-tile store.
    scale = bp_ref[len(layers)]          # (C, 1)
    shift = bp_ref[len(layers) + 1]      # (C, 1)
    cat = x1f + x2f
    o_ref[0] = hswish(cat * scale + shift) + x
    # TODO(synk): nn.Dropout is inference-mode identity here (training RNG mask not implemented).


# -------------------------------- wrapper ------------------------------------

def stem_forward(x, wpack, bpack):
    B, C, L = x.shape
    layers = _layer_defs(C)
    nw, nb = wpack.shape[0], bpack.shape[0]
    kernel = functools.partial(_stem_kernel, layers=layers)
    return pl.pallas_call(
        kernel,
        out_shape=jax.ShapeDtypeStruct((B, C, L), jnp.float32),
        grid=(B,),
        in_specs=[
            pl.BlockSpec((1, C, L), lambda b: (b, 0, 0)),
            pl.BlockSpec((nw, C, 3 * C), lambda b: (0, 0, 0)),   # packed conv weights
            pl.BlockSpec((nb, C, 1), lambda b: (0, 0, 0)),       # packed biases + BN
        ],
        out_specs=pl.BlockSpec((1, C, L), lambda b: (b, 0, 0)),
        compiler_params=pltpu.CompilerParams(
            dimension_semantics=("parallel",)),   # batch-parallel grid (v7x dual-TC)
    )(x, wpack, bpack)


# --------------------------- parameter construction --------------------------

def _nrm(key, shape, scale):
    return (scale * jax.random.normal(key, shape)).astype(jnp.float32)


def build_params(key, C):
    """Builds packed kernel params and torch-layout reference params.

    Returns:
      wpack: (n_layers, C, 3*C)  zero-padded, taps folded: W2[co, t*cin+ci] = w[co, ci, t]
      bpack: (n_layers + 2, C, 1) per-layer bias (BN-folded for BasicConv1d),
             plus stem BN scale / shift in the last two slots.
      ref_layers: list of (w (cout,cin,k), b (cout,1)) in torch layout.
      bn: (scale (C,1), shift (C,1)) for the reference.
    """
    layers = _layer_defs(C)
    keys = iter(jax.random.split(key, 80))

    wpack = jnp.zeros((len(layers), C, 3 * C), jnp.float32)
    bpack = jnp.zeros((len(layers) + 2, C, 1), jnp.float32)
    ref_layers = []

    for i, (cout, cin, k, _dil, _padl, _mxu, basic, roff, _full) in enumerate(layers):
        w = _nrm(next(keys), (cout, cin, k), 0.4)          # torch Conv1d layout
        if basic:
            # Conv1d(bias=False) + eval-mode BatchNorm1d folded to scale/bias
            gamma = 1.0 + _nrm(next(keys), (cout,), 0.1)
            beta = _nrm(next(keys), (cout,), 0.1)
            mean = _nrm(next(keys), (cout,), 0.1)
            var = 1.0 + jnp.abs(_nrm(next(keys), (cout,), 0.2))
            s = gamma / jnp.sqrt(var + 1e-5)
            w = w * s[:, None, None]
            b = (beta - mean * s)[:, None]
        else:
            # TCN conv: weight_norm at init == raw weight, with bias
            b = _nrm(next(keys), (cout, 1), 0.1)
        ref_layers.append((w, b))
        w2 = jnp.transpose(w, (0, 2, 1)).reshape(cout, k * cin)
        wpack = wpack.at[i, roff:roff + cout, :k * cin].set(w2)
        bpack = bpack.at[i, roff:roff + cout, :].set(b)

    # stem.bn (eval mode, folded to scale/bias over the concatenated channels)
    gamma = 1.0 + _nrm(next(keys), (C,), 0.1)
    beta = _nrm(next(keys), (C,), 0.1)
    mean = _nrm(next(keys), (C,), 0.1)
    var = 1.0 + jnp.abs(_nrm(next(keys), (C,), 0.2))
    s = gamma / jnp.sqrt(var + 1e-5)
    bpack = bpack.at[len(layers), :, 0].set(s)
    bpack = bpack.at[len(layers) + 1, :, 0].set(beta - mean * s)
    bn = (s[:, None], (beta - mean * s)[:, None])
    return wpack, bpack, ref_layers, bn


# ----------------------------- plain-JAX reference ---------------------------

def _ref_conv(v, w, b, dilation=1, pad_left=0):
    cout, cin, k = w.shape
    L = v.shape[1]
    pad_right = max(0, (k - 1) * dilation - pad_left)
    vp = jnp.pad(v, ((0, 0), (pad_left, pad_right)))
    acc = sum(jnp.dot(w[:, :, t], vp[:, t * dilation:t * dilation + L],
                      precision=lax.Precision.HIGHEST) for t in range(k))
    return acc + b


def stem_reference(x, ref_layers, bn):
    C = x.shape[1]
    layers = _layer_defs(C)
    relu = lambda a: jnp.maximum(a, 0.0)
    hswish = lambda a: a * jnp.clip(a + 3.0, 0.0, 6.0) / 6.0
    bns, bnb = bn

    def conv(i, v):
        _cout, _cin, _k, dil, padl, _m, _b, _r, _f = layers[i]
        w, b = ref_layers[i]
        return _ref_conv(v, w, b, dil, padl)

    def one(xb):
        out = relu(conv(0, xb))
        out = hswish(relu(conv(1, out)))
        x1 = relu(conv(2, out))
        x1 = relu(conv(3, x1))
        x2 = relu(conv(4, out))
        h = relu(conv(5, x2))
        h = relu(conv(6, h))
        x2 = relu(h + conv(7, x2))
        h = relu(conv(8, x2))
        h = relu(conv(9, h))
        x2 = relu(h + conv(10, x2))
        x2 = relu(conv(11, x2))
        cat = jnp.concatenate([x1, x2], axis=0)
        return hswish(cat * bns + bnb) + xb

    return jax.vmap(one)(x)


# ---------------------------------- main -------------------------------------

if __name__ == "__main__":
    B, C, L = 2, 8, 128          # C must be a multiple of 8 (module uses C // 8)
    key = jax.random.PRNGKey(0)
    kx, kp = jax.random.split(key)

    x = _nrm(kx, (B, C, L), 0.5)
    wpack, bpack, ref_layers, bn = build_params(kp, C)

    out = jax.block_until_ready(stem_forward(x, wpack, bpack))
    ref = stem_reference(x, ref_layers, bn)

    assert out.shape == (B, C, L) and out.dtype == jnp.float32
    if not jnp.allclose(out, ref, atol=2e-2, rtol=2e-2):
        max_err = float(jnp.max(jnp.abs(out - ref)))
        raise AssertionError(f"Pallas stem mismatch vs reference, max err = {max_err}")
    print("KERNEL_OK")
</pallas_src>

<mosaic_0001>
module attributes {stable_mosaic.version = 11 : i64} {
  func.func @_stem_kernel(%arg0: i32, %arg1: memref<1x8x128xf32, #tpu.memory_space<vmem>>, %arg2: memref<12x8x24xf32, #tpu.memory_space<vmem>>, %arg3: memref<14x8x1xf32, #tpu.memory_space<vmem>>, %arg4: memref<1x8x128xf32, #tpu.memory_space<vmem>>) attributes {dimension_semantics = [#tpu.dimension_semantics<parallel>], iteration_bounds = array<i64: 2>, scalar_prefetch = 0 : i64, scratch_operands = 0 : i64, tpu.core_type = #tpu.core_type<tc>, window_params = [{transform_indices = @transform_0, window_bounds = array<i64: 1, 8, 128>}, {pipeline_mode = #tpu.pipeline_mode<synchronous>, transform_indices = @transform_1, window_bounds = array<i64: 12, 8, 24>}, {pipeline_mode = #tpu.pipeline_mode<synchronous>, transform_indices = @transform_2, window_bounds = array<i64: 14, 8, 1>}, {transform_indices = @transform_3, window_bounds = array<i64: 1, 8, 128>}]} {
    %c0 = arith.constant 0 : index
    %c0_0 = arith.constant 0 : index
    %c0_1 = arith.constant 0 : index
    %0 = vector.load %arg1[%c0, %c0_0, %c0_1] : memref<1x8x128xf32, #tpu.memory_space<vmem>>, vector<1x8x128xf32>
    %1 = vector.shape_cast %0 : vector<1x8x128xf32> to vector<8x128xf32>
    %2 = tpu.iota {dimensions = array<i32: 1>} : vector<1x128xi32>
    %c0_2 = arith.constant 0 : index
    %c0_3 = arith.constant 0 : index
    %c0_4 = arith.constant 0 : index
    %3 = vector.load %arg2[%c0_2, %c0_3, %c0_4] : memref<12x8x24xf32, #tpu.memory_space<vmem>>, vector<1x8x24xf32>
    %4 = vector.shape_cast %3 : vector<1x8x24xf32> to vector<8x24xf32>
    %5 = vector.extract_strided_slice %4 {offsets = [0, 0], sizes = [8, 8], strides = [1, 1]} : vector<8x24xf32> to vector<8x8xf32>
    %c0_5 = arith.constant 0 : index
    %c0_6 = arith.constant 0 : index
    %c0_7 = arith.constant 0 : index
    %6 = vector.load %arg3[%c0_5, %c0_6, %c0_7] : memref<14x8x1xf32, #tpu.memory_space<vmem>>, vector<1x8x1xf32>
    %7 = vector.shape_cast %6 : vector<1x8x1xf32> to vector<8x1xf32>
    %cst = arith.constant dense<0.000000e+00> : vector<8x128xf32>
    %8 = tpu.matmul %5, %1, %cst {dimension_numbers = #tpu.dot_dimension_numbers<[1], [0], [0], [1], [0, 0, 1, 1], [], []>} : vector<8x8xf32>, vector<8x128xf32>, vector<8x128xf32> -> vector<8x128xf32>
    %9 = vector.broadcast %7 : vector<8x1xf32> to vector<8x128xf32>
    %10 = arith.addf %8, %9 : vector<8x128xf32>
    %cst_8 = arith.constant 0.000000e+00 : f32
    %11 = vector.broadcast %cst_8 : f32 to vector<8x128xf32>
    %12 = arith.maximumf %10, %11 : vector<8x128xf32>
    %c1 = arith.constant 1 : index
    %c0_9 = arith.constant 0 : index
    %c0_10 = arith.constant 0 : index
    %13 = vector.load %arg2[%c1, %c0_9, %c0_10] : memref<12x8x24xf32, #tpu.memory_space<vmem>>, vector<1x8x24xf32>
    %14 = vector.shape_cast %13 : vector<1x8x24xf32> to vector<8x24xf32>
    %c1_11 = arith.constant 1 : index
    %c0_12 = arith.constant 0 : index
    %c0_13 = arith.constant 0 : index
    %15 = vector.load %arg3[%c1_11, %c0_12, %c0_13] : memref<14x8x1xf32, #tpu.memory_space<vmem>>, vector<1x8x1xf32>
    %16 = vector.shape_cast %15 : vector<1x8x1xf32> to vector<8x1xf32>
    %c1_i32 = arith.constant 1 : i32
    %17 = tpu.dynamic_rotate %12 by %c1_i32 dim 1 : vector<8x128xf32>, i32 -> vector<8x128xf32>
    %c1_i32_14 = arith.constant 1 : i32
    %18 = vector.broadcast %c1_i32_14 : i32 to vector<1x128xi32>
    %19 = arith.cmpi sge, %2, %18 : vector<1x128xi32>
    %cst_15 = arith.constant 0.000000e+00 : f32
    %20 = vector.shape_cast %19 : vector<1x128xi1> to vector<1x128xi1>
    %21 = vector.broadcast %20 : vector<1x128xi1> to vector<8x128xi1>
    %22 = vector.broadcast %cst_15 : f32 to vector<8x128xf32>
    %23 = arith.select %21, %17, %22 : vector<8x128xi1>, vector<8x128xf32>
    %c127_i32 = arith.constant 127 : i32
    %24 = tpu.dynamic_rotate %12 by %c127_i32 dim 1 : vector<8x128xf32>, i32 -> vector<8x128xf32>
    %c127_i32_16 = arith.constant 127 : i32
    %25 = vector.broadcast %c127_i32_16 : i32 to vector<1x128xi32>
    %26 = arith.cmpi slt, %2, %25 : vector<1x128xi32>
    %cst_17 = arith.constant 0.000000e+00 : f32
    %27 = vector.shape_cast %26 : vector<1x128xi1> to vector<1x128xi1>
    %28 = vector.broadcast %27 : vector<1x128xi1> to vector<8x128xi1>
    %29 = vector.broadcast %cst_17 : f32 to vector<8x128xf32>
    %30 = arith.select %28, %24, %29 : vector<8x128xi1>, vector<8x128xf32>
    %31 = tpu.concatenate %23, %12, %30 in 0 : vector<8x128xf32>, vector<8x128xf32>, vector<8x128xf32> -> vector<24x128xf32>
    %cst_18 = arith.constant dense<0.000000e+00> : vector<8x128xf32>
    %32 = tpu.matmul %14, %31, %cst_18 {dimension_numbers = #tpu.dot_dimension_numbers<[1], [0], [0], [1], [0, 0, 1, 1], [], []>} : vector<8x24xf32>, vector<24x128xf32>, vector<8x128xf32> -> vector<8x128xf32>
    %33 = vector.broadcast %16 : vector<8x1xf32> to vector<8x128xf32>
    %34 = arith.addf %32, %33 : vector<8x128xf32>
    %cst_19 = arith.constant 0.000000e+00 : f32
    %35 = vector.broadcast %cst_19 : f32 to vector<8x128xf32>
    %36 = arith.maximumf %34, %35 : vector<8x128xf32>
    %cst_20 = arith.constant 3.000000e+00 : f32
    %37 = vector.broadcast %cst_20 : f32 to vector<8x128xf32>
    %38 = arith.addf %36, %37 : vector<8x128xf32>
    %cst_21 = arith.constant 0.000000e+00 : f32
    %cst_22 = arith.constant 6.000000e+00 : f32
    %39 = vector.broadcast %cst_21 : f32 to vector<8x128xf32>
    %40 = arith.maximumf %39, %38 : vector<8x128xf32>
    %41 = vector.broadcast %cst_22 : f32 to vector<8x128xf32>
    %42 = arith.minimumf %41, %40 : vector<8x128xf32>
    %43 = arith.mulf %36, %42 : vector<8x128xf32>
    %cst_23 = arith.constant 0.166666672 : f32
    %44 = vector.broadcast %cst_23 : f32 to vector<8x128xf32>
    %45 = arith.mulf %43, %44 : vector<8x128xf32>
    %c2 = arith.constant 2 : index
    %c0_24 = arith.constant 0 : index
    %c0_25 = arith.constant 0 : index
    %46 = vector.load %arg2[%c2, %c0_24, %c0_25] : memref<12x8x24xf32, #tpu.memory_space<vmem>>, vector<1x8x24xf32>
    %47 = vector.shape_cast %46 : vector<1x8x24xf32> to vector<8x24xf32>
    %48 = vector.extract_strided_slice %47 {offsets = [0, 0], sizes = [4, 24], strides = [1, 1]} : vector<8x24xf32> to vector<4x24xf32>
    %c2_26 = arith.constant 2 : index
    %c0_27 = arith.constant 0 : index
    %c0_28 = arith.constant 0 : index
    %49 = vector.load %arg3[%c2_26, %c0_27, %c0_28] : memref<14x8x1xf32, #tpu.memory_space<vmem>>, vector<1x8x1xf32>
    %50 = vector.shape_cast %49 : vector<1x8x1xf32> to vector<8x1xf32>
    %51 = vector.extract_strided_slice %50 {offsets = [0, 0], sizes = [4, 1], strides = [1, 1]} : vector<8x1xf32> to vector<4x1xf32>
    %c1_i32_29 = arith.constant 1 : i32
    %52 = tpu.dynamic_rotate %45 by %c1_i32_29 dim 1 : vector<8x128xf32>, i32 -> vector<8x128xf32>
    %c1_i32_30 = arith.constant 1 : i32
    %53 = vector.broadcast %c1_i32_30 : i32 to vector<1x128xi32>
    %54 = arith.cmpi sge, %2, %53 : vector<1x128xi32>
    %cst_31 = arith.constant 0.000000e+00 : f32
    %55 = vector.shape_cast %54 : vector<1x128xi1> to vector<1x128xi1>
    %56 = vector.broadcast %55 : vector<1x128xi1> to vector<8x128xi1>
    %57 = vector.broadcast %cst_31 : f32 to vector<8x128xf32>
    %58 = arith.select %56, %52, %57 : vector<8x128xi1>, vector<8x128xf32>
    %c127_i32_32 = arith.constant 127 : i32
    %59 = tpu.dynamic_rotate %45 by %c127_i32_32 dim 1 : vector<8x128xf32>, i32 -> vector<8x128xf32>
    %c127_i32_33 = arith.constant 127 : i32
    %60 = vector.broadcast %c127_i32_33 : i32 to vector<1x128xi32>
    %61 = arith.cmpi slt, %2, %60 : vector<1x128xi32>
    %cst_34 = arith.constant 0.000000e+00 : f32
    %62 = vector.shape_cast %61 : vector<1x128xi1> to vector<1x128xi1>
    %63 = vector.broadcast %62 : vector<1x128xi1> to vector<8x128xi1>
    %64 = vector.broadcast %cst_34 : f32 to vector<8x128xf32>
    %65 = arith.select %63, %59, %64 : vector<8x128xi1>, vector<8x128xf32>
    %66 = tpu.concatenate %58, %45, %65 in 0 : vector<8x128xf32>, vector<8x128xf32>, vector<8x128xf32> -> vector<24x128xf32>
    %cst_35 = arith.constant dense<0.000000e+00> : vector<4x128xf32>
    %67 = tpu.matmul %48, %66, %cst_35 {dimension_numbers = #tpu.dot_dimension_numbers<[1], [0], [0], [1], [0, 0, 1, 1], [], []>} : vector<4x24xf32>, vector<24x128xf32>, vector<4x128xf32> -> vector<4x128xf32>
    %68 = vector.broadcast %51 : vector<4x1xf32> to vector<4x128xf32>
    %69 = arith.addf %67, %68 : vector<4x128xf32>
    %cst_36 = arith.constant 0.000000e+00 : f32
    %70 = vector.broadcast %cst_36 : f32 to vector<4x128xf32>
    %71 = arith.maximumf %69, %70 : vector<4x128xf32>
    %c3 = arith.constant 3 : index
    %c0_37 = arith.constant 0 : index
    %c0_38 = arith.constant 0 : index
    %72 = vector.load %arg2[%c3, %c0_37, %c0_38] : memref<12x8x24xf32, #tpu.memory_space<vmem>>, vector<1x8x24xf32>
    %73 = vector.shape_cast %72 : vector<1x8x24xf32> to vector<8x24xf32>
    %74 = vector.extract_strided_slice %73 {offsets = [0, 0], sizes = [8, 12], strides = [1, 1]} : vector<8x24xf32> to vector<8x12xf32>
    %c3_39 = arith.constant 3 : index
    %c0_40 = arith.constant 0 : index
    %c0_41 = arith.constant 0 : index
    %75 = vector.load %arg3[%c3_39, %c0_40, %c0_41] : memref<14x8x1xf32, #tpu.memory_space<vmem>>, vector<1x8x1xf32>
    %76 = vector.shape_cast %75 : vector<1x8x1xf32> to vector<8x1xf32>
    %c1_i32_42 = arith.constant 1 : i32
    %77 = tpu.dynamic_rotate %71 by %c1_i32_42 dim 1 : vector<4x128xf32>, i32 -> vector<4x128xf32>
    %c1_i32_43 = arith.constant 1 : i32
    %78 = vector.broadcast %c1_i32_43 : i32 to vector<1x128xi32>
    %79 = arith.cmpi sge, %2, %78 : vector<1x128xi32>
    %cst_44 = arith.constant 0.000000e+00 : f32
    %80 = vector.shape_cast %79 : vector<1x128xi1> to vector<1x128xi1>
    %81 = vector.broadcast %80 : vector<1x128xi1> to vector<4x128xi1>
    %82 = vector.broadcast %cst_44 : f32 to vector<4x128xf32>
    %83 = arith.select %81, %77, %82 : vector<4x128xi1>, vector<4x128xf32>
    %c127_i32_45 = arith.constant 127 : i32
    %84 = tpu.dynamic_rotate %71 by %c127_i32_45 dim 1 : vector<4x128xf32>, i32 -> vector<4x128xf32>
    %c127_i32_46 = arith.constant 127 : i32
    %85 = vector.broadcast %c127_i32_46 : i32 to vector<1x128xi32>
    %86 = arith.cmpi slt, %2, %85 : vector<1x128xi32>
    %cst_47 = arith.constant 0.000000e+00 : f32
    %87 = vector.shape_cast %86 : vector<1x128xi1> to vector<1x128xi1>
    %88 = vector.broadcast %87 : vector<1x128xi1> to vector<4x128xi1>
    %89 = vector.broadcast %cst_47 : f32 to vector<4x128xf32>
    %90 = arith.select %88, %84, %89 : vector<4x128xi1>, vector<4x128xf32>
    %91 = vector.extract_strided_slice %74 {offsets = [0, 0], sizes = [8, 4], strides = [1, 1]} : vector<8x12xf32> to vector<8x4xf32>
    %cst_48 = arith.constant dense<0.000000e+00> : vector<8x128xf32>
    %92 = tpu.matmul %91, %83, %cst_48 {dimension_numbers = #tpu.dot_dimension_numbers<[1], [0], [0], [1], [0, 0, 1, 1], [], []>} : vector<8x4xf32>, vector<4x128xf32>, vector<8x128xf32> -> vector<8x128xf32>
    %93 = vector.extract_strided_slice %74 {offsets = [0, 4], sizes = [8, 4], strides = [1, 1]} : vector<8x12xf32> to vector<8x4xf32>
    %cst_49 = arith.constant dense<0.000000e+00> : vector<8x128xf32>
    %94 = tpu.matmul %93, %71, %cst_49 {dimension_numbers = #tpu.dot_dimension_numbers<[1], [0], [0], [1], [0, 0, 1, 1], [], []>} : vector<8x4xf32>, vector<4x128xf32>, vector<8x128xf32> -> vector<8x128xf32>
    %95 = arith.addf %92, %94 : vector<8x128xf32>
    %96 = vector.extract_strided_slice %74 {offsets = [0, 8], sizes = [8, 4], strides = [1, 1]} : vector<8x12xf32> to vector<8x4xf32>
    %cst_50 = arith.constant dense<0.000000e+00> : vector<8x128xf32>
    %97 = tpu.matmul %96, %90, %cst_50 {dimension_numbers = #tpu.dot_dimension_numbers<[1], [0], [0], [1], [0, 0, 1, 1], [], []>} : vector<8x4xf32>, vector<4x128xf32>, vector<8x128xf32> -> vector<8x128xf32>
    %98 = arith.addf %95, %97 : vector<8x128xf32>
    %99 = vector.broadcast %76 : vector<8x1xf32> to vector<8x128xf32>
    %100 = arith.addf %98, %99 : vector<8x128xf32>
    %cst_51 = arith.constant 0.000000e+00 : f32
    %101 = vector.broadcast %cst_51 : f32 to vector<8x128xf32>
    %102 = arith.maximumf %100, %101 : vector<8x128xf32>
    %c4 = arith.constant 4 : index
    %c0_52 = arith.constant 0 : index
    %c0_53 = arith.constant 0 : index
    %103 = vector.load %arg2[%c4, %c0_52, %c0_53] : memref<12x8x24xf32, #tpu.memory_space<vmem>>, vector<1x8x24xf32>
    %104 = vector.shape_cast %103 : vector<1x8x24xf32> to vector<8x24xf32>
    %105 = vector.extract_strided_slice %104 {offsets = [0, 0], sizes = [4, 8], strides = [1, 1]} : vector<8x24xf32> to vector<4x8xf32>
    %c4_54 = arith.constant 4 : index
    %c0_55 = arith.constant 0 : index
    %c0_56 = arith.constant 0 : index
    %106 = vector.load %arg3[%c4_54, %c0_55, %c0_56] : memref<14x8x1xf32, #tpu.memory_space<vmem>>, vector<1x8x1xf32>
    %107 = vector.shape_cast %106 : vector<1x8x1xf32> to vector<8x1xf32>
    %108 = vector.extract_strided_slice %107 {offsets = [0, 0], sizes = [4, 1], strides = [1, 1]} : vector<8x1xf32> to vector<4x1xf32>
    %cst_57 = arith.constant dense<0.000000e+00> : vector<4x128xf32>
    %109 = tpu.matmul %105, %45, %cst_57 {dimension_numbers = #tpu.dot_dimension_numbers<[1], [0], [0], [1], [0, 0, 1, 1], [], []>} : vector<4x8xf32>, vector<8x128xf32>, vector<4x128xf32> -> vector<4x128xf32>
    %110 = vector.broadcast %108 : vector<4x1xf32> to vector<4x128xf32>
    %111 = arith.addf %109, %110 : vector<4x128xf32>
    %cst_58 = arith.constant 0.000000e+00 : f32
    %112 = vector.broadcast %cst_58 : f32 to vector<4x128xf32>
    %113 = arith.maximumf %111, %112 : vector<4x128xf32>
    %c5 = arith.constant 5 : index
    %c0_59 = arith.constant 0 : index
    %c0_60 = arith.constant 0 : index
    %114 = vector.load %arg2[%c5, %c0_59, %c0_60] : memref<12x8x24xf32, #tpu.memory_space<vmem>>, vector<1x8x24xf32>
    %115 = vector.shape_cast %114 : vector<1x8x24xf32> to vector<8x24xf32>
    %116 = vector.extract_strided_slice %115 {offsets = [0, 0], sizes = [2, 8], strides = [1, 1]} : vector<8x24xf32> to vector<2x8xf32>
    %c5_61 = arith.constant 5 : index
    %c0_62 = arith.constant 0 : index
    %c0_63 = arith.constant 0 : index
    %117 = vector.load %arg3[%c5_61, %c0_62, %c0_63] : memref<14x8x1xf32, #tpu.memory_space<vmem>>, vector<1x8x1xf32>
    %118 = vector.shape_cast %117 : vector<1x8x1xf32> to vector<8x1xf32>
    %119 = vector.extract_strided_slice %118 {offsets = [0, 0], sizes = [2, 1], strides = [1, 1]} : vector<8x1xf32> to vector<2x1xf32>
    %c1_i32_64 = arith.constant 1 : i32
    %120 = tpu.dynamic_rotate %113 by %c1_i32_64 dim 1 : vector<4x128xf32>, i32 -> vector<4x128xf32>
    %c1_i32_65 = arith.constant 1 : i32
    %121 = vector.broadcast %c1_i32_65 : i32 to vector<1x128xi32>
    %122 = arith.cmpi sge, %2, %121 : vector<1x128xi32>
    %cst_66 = arith.constant 0.000000e+00 : f32
    %123 = vector.shape_cast %122 : vector<1x128xi1> to vector<1x128xi1>
    %124 = vector.broadcast %123 : vector<1x128xi1> to vector<4x128xi1>
    %125 = vector.broadcast %cst_66 : f32 to vector<4x128xf32>
    %126 = arith.select %124, %120, %125 : vector<4x128xi1>, vector<4x128xf32>
    %127 = vector.extract_strided_slice %116 {offsets = [0, 0], sizes = [2, 1], strides = [1, 1]} : vector<2x8xf32> to vector<2x1xf32>
    %128 = vector.extract_strided_slice %126 {offsets = [0, 0], sizes = [1, 128], strides = [1, 1]} : vector<4x128xf32> to vector<1x128xf32>
    %129 = vector.broadcast %127 : vector<2x1xf32> to vector<2x128xf32>
    %130 = vector.broadcast %128 : vector<1x128xf32> to vector<2x128xf32>
    %131 = arith.mulf %129, %130 : vector<2x128xf32>
    %132 = vector.extract_strided_slice %116 {offsets = [0, 1], sizes = [2, 1], strides = [1, 1]} : vector<2x8xf32> to vector<2x1xf32>
    %133 = vector.extract_strided_slice %126 {offsets = [1, 0], sizes = [1, 128], strides = [1, 1]} : vector<4x128xf32> to vector<1x128xf32>
    %134 = vector.broadcast %132 : vector<2x1xf32> to vector<2x128xf32>
    %135 = vector.broadcast %133 : vector<1x128xf32> to vector<2x128xf32>
    %136 = arith.mulf %134, %135 : vector<2x128xf32>
    %137 = arith.addf %131, %136 : vector<2x128xf32>
    %138 = vector.extract_strided_slice %116 {offsets = [0, 2], sizes = [2, 1], strides = [1, 1]} : vector<2x8xf32> to vector<2x1xf32>
    %139 = vector.extract_strided_slice %126 {offsets = [2, 0], sizes = [1, 128], strides = [1, 1]} : vector<4x128xf32> to vector<1x128xf32>
    %140 = vector.broadcast %138 : vector<2x1xf32> to vector<2x128xf32>
    %141 = vector.broadcast %139 : vector<1x128xf32> to vector<2x128xf32>
    %142 = arith.mulf %140, %141 : vector<2x128xf32>
    %143 = arith.addf %137, %142 : vector<2x128xf32>
    %144 = vector.extract_strided_slice %116 {offsets = [0, 3], sizes = [2, 1], strides = [1, 1]} : vector<2x8xf32> to vector<2x1xf32>
    %145 = vector.extract_strided_slice %126 {offsets = [3, 0], sizes = [1, 128], strides = [1, 1]} : vector<4x128xf32> to vector<1x128xf32>
    %146 = vector.broadcast %144 : vector<2x1xf32> to vector<2x128xf32>
    %147 = vector.broadcast %145 : vector<1x128xf32> to vector<2x128xf32>
    %148 = arith.mulf %146, %147 : vector<2x128xf32>
    %149 = arith.addf %143, %148 : vector<2x128xf32>
    %150 = vector.extract_strided_slice %116 {offsets = [0, 4], sizes = [2, 1], strides = [1, 1]} : vector<2x8xf32> to vector<2x1xf32>
    %151 = vector.extract_strided_slice %113 {offsets = [0, 0], sizes = [1, 128], strides = [1, 1]} : vector<4x128xf32> to vector<1x128xf32>
    %152 = vector.broadcast %150 : vector<2x1xf32> to vector<2x128xf32>
    %153 = vector.broadcast %151 : vector<1x128xf32> to vector<2x128xf32>
    %154 = arith.mulf %152, %153 : vector<2x128xf32>
    %155 = arith.addf %149, %154 : vector<2x128xf32>
    %156 = vector.extract_strided_slice %116 {offsets = [0, 5], sizes = [2, 1], strides = [1, 1]} : vector<2x8xf32> to vector<2x1xf32>
    %157 = vector.extract_strided_slice %113 {offsets = [1, 0], sizes = [1, 128], strides = [1, 1]} : vector<4x128xf32> to vector<1x128xf32>
    %158 = vector.broadcast %156 : vector<2x1xf32> to vector<2x128xf32>
    %159 = vector.broadcast %157 : vector<1x128xf32> to vector<2x128xf32>
    %160 = arith.mulf %158, %159 : vector<2x128xf32>
    %161 = arith.addf %155, %160 : vector<2x128xf32>
    %162 = vector.extract_strided_slice %116 {offsets = [0, 6], sizes = [2, 1], strides = [1, 1]} : vector<2x8xf32> to vector<2x1xf32>
    %163 = vector.extract_strided_slice %113 {offsets = [2, 0], sizes = [1, 128], strides = [1, 1]} : vector<4x128xf32> to vector<1x128xf32>
    %164 = vector.broadcast %162 : vector<2x1xf32> to vector<2x128xf32>
    %165 = vector.broadcast %163 : vector<1x128xf32> to vector<2x128xf32>
    %166 = arith.mulf %164, %165 : vector<2x128xf32>
    %167 = arith.addf %161, %166 : vector<2x128xf32>
    %168 = vector.extract_strided_slice %116 {offsets = [0, 7], sizes = [2, 1], strides = [1, 1]} : vector<2x8xf32> to vector<2x1xf32>
    %169 = vector.extract_strided_slice %113 {offsets = [3, 0], sizes = [1, 128], strides = [1, 1]} : vector<4x128xf32> to vector<1x128xf32>
    %170 = vector.broadcast %168 : vector<2x1xf32> to vector<2x128xf32>
    %171 = vector.broadcast %169 : vector<1x128xf32> to vector<2x128xf32>
    %172 = arith.mulf %170, %171 : vector<2x128xf32>
    %173 = arith.addf %167, %172 : vector<2x128xf32>
    %174 = vector.broadcast %119 : vector<2x1xf32> to vector<2x128xf32>
    %175 = arith.addf %173, %174 : vector<2x128xf32>
    %cst_67 = arith.constant 0.000000e+00 : f32
    %176 = vector.broadcast %cst_67 : f32 to vector<2x128xf32>
    %177 = arith.maximumf %175, %176 : vector<2x128xf32>
    %c6 = arith.constant 6 : index
    %c0_68 = arith.constant 0 : index
    %c0_69 = arith.constant 0 : index
    %178 = vector.load %arg2[%c6, %c0_68, %c0_69] : memref<12x8x24xf32, #tpu.memory_space<vmem>>, vector<1x8x24xf32>
    %179 = vector.shape_cast %178 : vector<1x8x24xf32> to vector<8x24xf32>
    %180 = vector.extract_strided_slice %179 {offsets = [0, 0], sizes = [2, 4], strides = [1, 1]} : vector<8x24xf32> to vector<2x4xf32>
    %c6_70 = arith.constant 6 : index
    %c0_71 = arith.constant 0 : index
    %c0_72 = arith.constant 0 : index
    %181 = vector.load %arg3[%c6_70, %c0_71, %c0_72] : memref<14x8x1xf32, #tpu.memory_space<vmem>>, vector<1x8x1xf32>
    %182 = vector.shape_cast %181 : vector<1x8x1xf32> to vector<8x1xf32>
    %183 = vector.extract_strided_slice %182 {offsets = [0, 0], sizes = [2, 1], strides = [1, 1]} : vector<8x1xf32> to vector<2x1xf32>
    %c1_i32_73 = arith.constant 1 : i32
    %184 = tpu.dynamic_rotate %177 by %c1_i32_73 dim 1 : vector<2x128xf32>, i32 -> vector<2x128xf32>
    %c1_i32_74 = arith.constant 1 : i32
    %185 = vector.broadcast %c1_i32_74 : i32 to vector<1x128xi32>
    %186 = arith.cmpi sge, %2, %185 : vector<1x128xi32>
    %cst_75 = arith.constant 0.000000e+00 : f32
    %187 = vector.shape_cast %186 : vector<1x128xi1> to vector<1x128xi1>
    %188 = vector.broadcast %187 : vector<1x128xi1> to vector<2x128xi1>
    %189 = vector.broadcast %cst_75 : f32 to vector<2x128xf32>
    %190 = arith.select %188, %184, %189 : vector<2x128xi1>, vector<2x128xf32>
    %191 = vector.extract_strided_slice %180 {offsets = [0, 0], sizes = [2, 1], strides = [1, 1]} : vector<2x4xf32> to vector<2x1xf32>
    %192 = vector.extract_strided_slice %190 {offsets = [0, 0], sizes = [1, 128], strides = [1, 1]} : vector<2x128xf32> to vector<1x128xf32>
    %193 = vector.broadcast %191 : vector<2x1xf32> to vector<2x128xf32>
    %194 = vector.broadcast %192 : vector<1x128xf32> to vector<2x128xf32>
    %195 = arith.mulf %193, %194 : vector<2x128xf32>
    %196 = vector.extract_strided_slice %180 {offsets = [0, 1], sizes = [2, 1], strides = [1, 1]} : vector<2x4xf32> to vector<2x1xf32>
    %197 = vector.extract_strided_slice %190 {offsets = [1, 0], sizes = [1, 128], strides = [1, 1]} : vector<2x128xf32> to vector<1x128xf32>
    %198 = vector.broadcast %196 : vector<2x1xf32> to vector<2x128xf32>
    %199 = vector.broadcast %197 : vector<1x128xf32> to vector<2x128xf32>
    %200 = arith.mulf %198, %199 : vector<2x128xf32>
    %201 = arith.addf %195, %200 : vector<2x128xf32>
    %202 = vector.extract_strided_slice %180 {offsets = [0, 2], sizes = [2, 1], strides = [1, 1]} : vector<2x4xf32> to vector<2x1xf32>
    %203 = vector.extract_strided_slice %177 {offsets = [0, 0], sizes = [1, 128], strides = [1, 1]} : vector<2x128xf32> to vector<1x128xf32>
    %204 = vector.broadcast %202 : vector<2x1xf32> to vector<2x128xf32>
    %205 = vector.broadcast %203 : vector<1x128xf32> to vector<2x128xf32>
    %206 = arith.mulf %204, %205 : vector<2x128xf32>
    %207 = arith.addf %201, %206 : vector<2x128xf32>
    %208 = vector.extract_strided_slice %180 {offsets = [0, 3], sizes = [2, 1], strides = [1, 1]} : vector<2x4xf32> to vector<2x1xf32>
    %209 = vector.extract_strided_slice %177 {offsets = [1, 0], sizes = [1, 128], strides = [1, 1]} : vector<2x128xf32> to vector<1x128xf32>
    %210 = vector.broadcast %208 : vector<2x1xf32> to vector<2x128xf32>
    %211 = vector.broadcast %209 : vector<1x128xf32> to vector<2x128xf32>
    %212 = arith.mulf %210, %211 : vector<2x128xf32>
    %213 = arith.addf %207, %212 : vector<2x128xf32>
    %214 = vector.broadcast %183 : vector<2x1xf32> to vector<2x128xf32>
    %215 = arith.addf %213, %214 : vector<2x128xf32>
    %cst_76 = arith.constant 0.000000e+00 : f32
    %216 = vector.broadcast %cst_76 : f32 to vector<2x128xf32>
    %217 = arith.maximumf %215, %216 : vector<2x128xf32>
    %c7 = arith.constant 7 : index
    %c0_77 = arith.constant 0 : index
    %c0_78 = arith.constant 0 : index
    %218 = vector.load %arg2[%c7, %c0_77, %c0_78] : memref<12x8x24xf32, #tpu.memory_space<vmem>>, vector<1x8x24xf32>
    %219 = vector.shape_cast %218 : vector<1x8x24xf32> to vector<8x24xf32>
    %220 = vector.extract_strided_slice %219 {offsets = [0, 0], sizes = [2, 4], strides = [1, 1]} : vector<8x24xf32> to vector<2x4xf32>
    %c7_79 = arith.constant 7 : index
    %c0_80 = arith.constant 0 : index
    %c0_81 = arith.constant 0 : index
    %221 = vector.load %arg3[%c7_79, %c0_80, %c0_81] : memref<14x8x1xf32, #tpu.memory_space<vmem>>, vector<1x8x1xf32>
    %222 = vector.shape_cast %221 : vector<1x8x1xf32> to vector<8x1xf32>
    %223 = vector.extract_strided_slice %222 {offsets = [0, 0], sizes = [2, 1], strides = [1, 1]} : vector<8x1xf32> to vector<2x1xf32>
    %224 = vector.extract_strided_slice %220 {offsets = [0, 0], sizes = [2, 1], strides = [1, 1]} : vector<2x4xf32> to vector<2x1xf32>
    %225 = vector.extract_strided_slice %113 {offsets = [0, 0], sizes = [1, 128], strides = [1, 1]} : vector<4x128xf32> to vector<1x128xf32>
    %226 = vector.broadcast %224 : vector<2x1xf32> to vector<2x128xf32>
    %227 = vector.broadcast %225 : vector<1x128xf32> to vector<2x128xf32>
    %228 = arith.mulf %226, %227 : vector<2x128xf32>
    %229 = vector.extract_strided_slice %220 {offsets = [0, 1], sizes = [2, 1], strides = [1, 1]} : vector<2x4xf32> to vector<2x1xf32>
    %230 = vector.extract_strided_slice %113 {offsets = [1, 0], sizes = [1, 128], strides = [1, 1]} : vector<4x128xf32> to vector<1x128xf32>
    %231 = vector.broadcast %229 : vector<2x1xf32> to vector<2x128xf32>
    %232 = vector.broadcast %230 : vector<1x128xf32> to vector<2x128xf32>
    %233 = arith.mulf %231, %232 : vector<2x128xf32>
    %234 = arith.addf %228, %233 : vector<2x128xf32>
    %235 = vector.extract_strided_slice %220 {offsets = [0, 2], sizes = [2, 1], strides = [1, 1]} : vector<2x4xf32> to vector<2x1xf32>
    %236 = vector.extract_strided_slice %113 {offsets = [2, 0], sizes = [1, 128], strides = [1, 1]} : vector<4x128xf32> to vector<1x128xf32>
    %237 = vector.broadcast %235 : vector<2x1xf32> to vector<2x128xf32>
    %238 = vector.broadcast %236 : vector<1x128xf32> to vector<2x128xf32>
    %239 = arith.mulf %237, %238 : vector<2x128xf32>
    %240 = arith.addf %234, %239 : vector<2x128xf32>
    %241 = vector.extract_strided_slice %220 {offsets = [0, 3], sizes = [2, 1], strides = [1, 1]} : vector<2x4xf32> to vector<2x1xf32>
    %242 = vector.extract_strided_slice %113 {offsets = [3, 0], sizes = [1, 128], strides = [1, 1]} : vector<4x128xf32> to vector<1x128xf32>
    %243 = vector.broadcast %241 : vector<2x1xf32> to vector<2x128xf32>
    %244 = vector.broadcast %242 : vector<1x128xf32> to vector<2x128xf32>
    %245 = arith.mulf %243, %244 : vector<2x128xf32>
    %246 = arith.addf %240, %245 : vector<2x128xf32>
    %247 = vector.broadcast %223 : vector<2x1xf32> to vector<2x128xf32>
    %248 = arith.addf %246, %247 : vector<2x128xf32>
    %249 = arith.addf %217, %248 : vector<2x128xf32>
    %cst_82 = arith.constant 0.000000e+00 : f32
    %250 = vector.broadcast %cst_82 : f32 to vector<2x128xf32>
    %251 = arith.maximumf %249, %250 : vector<2x128xf32>
    %c8 = arith.constant 8 : index
    %c0_83 = arith.constant 0 : index
    %c0_84 = arith.constant 0 : index
    %252 = vector.load %arg2[%c8, %c0_83, %c0_84] : memref<12x8x24xf32, #tpu.memory_space<vmem>>, vector<1x8x24xf32>
    %253 = vector.shape_cast %252 : vector<1x8x24xf32> to vector<8x24xf32>
    %254 = vector.extract_strided_slice %253 {offsets = [0, 0], sizes = [1, 4], strides = [1, 1]} : vector<8x24xf32> to vector<1x4xf32>
    %c8_85 = arith.constant 8 : index
    %c0_86 = arith.constant 0 : index
    %c0_87 = arith.constant 0 : index
    %255 = vector.load %arg3[%c8_85, %c0_86, %c0_87] : memref<14x8x1xf32, #tpu.memory_space<vmem>>, vector<1x8x1xf32>
    %256 = vector.shape_cast %255 : vector<1x8x1xf32> to vector<8x1xf32>
    %257 = vector.extract_strided_slice %256 {offsets = [0, 0], sizes = [1, 1], strides = [1, 1]} : vector<8x1xf32> to vector<1x1xf32>
    %c2_i32 = arith.constant 2 : i32
    %258 = tpu.dynamic_rotate %251 by %c2_i32 dim 1 : vector<2x128xf32>, i32 -> vector<2x128xf32>
    %c2_i32_88 = arith.constant 2 : i32
    %259 = vector.broadcast %c2_i32_88 : i32 to vector<1x128xi32>
    %260 = arith.cmpi sge, %2, %259 : vector<1x128xi32>
    %cst_89 = arith.constant 0.000000e+00 : f32
    %261 = vector.shape_cast %260 : vector<1x128xi1> to vector<1x128xi1>
    %262 = vector.broadcast %261 : vector<1x128xi1> to vector<2x128xi1>
    %263 = vector.broadcast %cst_89 : f32 to vector<2x128xf32>
    %264 = arith.select %262, %258, %263 : vector<2x128xi1>, vector<2x128xf32>
    %265 = vector.extract_strided_slice %254 {offsets = [0, 0], sizes = [1, 1], strides = [1, 1]} : vector<1x4xf32> to vector<1x1xf32>
    %266 = vector.extract_strided_slice %264 {offsets = [0, 0], sizes = [1, 128], strides = [1, 1]} : vector<2x128xf32> to vector<1x128xf32>
    %267 = vector.broadcast %265 : vector<1x1xf32> to vector<1x128xf32>
    %268 = arith.mulf %267, %266 : vector<1x128xf32>
    %269 = vector.extract_strided_slice %254 {offsets = [0, 1], sizes = [1, 1], strides = [1, 1]} : vector<1x4xf32> to vector<1x1xf32>
    %270 = vector.extract_strided_slice %264 {offsets = [1, 0], sizes = [1, 128], strides = [1, 1]} : vector<2x128xf32> to vector<1x128xf32>
    %271 = vector.broadcast %269 : vector<1x1xf32> to vector<1x128xf32>
    %272 = arith.mulf %271, %270 : vector<1x128xf32>
    %273 = arith.addf %268, %272 : vector<1x128xf32>
    %274 = vector.extract_strided_slice %254 {offsets = [0, 2], sizes = [1, 1], strides = [1, 1]} : vector<1x4xf32> to vector<1x1xf32>
    %275 = vector.extract_strided_slice %251 {offsets = [0, 0], sizes = [1, 128], strides = [1, 1]} : vector<2x128xf32> to vector<1x128xf32>
    %276 = vector.broadcast %274 : vector<1x1xf32> to vector<1x128xf32>
    %277 = arith.mulf %276, %275 : vector<1x128xf32>
    %278 = arith.addf %273, %277 : vector<1x128xf32>
    %279 = vector.extract_strided_slice %254 {offsets = [0, 3], sizes = [1, 1], strides = [1, 1]} : vector<1x4xf32> to vector<1x1xf32>
    %280 = vector.extract_strided_slice %251 {offsets = [1, 0], sizes = [1, 128], strides = [1, 1]} : vector<2x128xf32> to vector<1x128xf32>
    %281 = vector.broadcast %279 : vector<1x1xf32> to vector<1x128xf32>
    %282 = arith.mulf %281, %280 : vector<1x128xf32>
    %283 = arith.addf %278, %282 : vector<1x128xf32>
    %284 = vector.broadcast %257 : vector<1x1xf32> to vector<1x128xf32>
    %285 = arith.addf %283, %284 : vector<1x128xf32>
    %cst_90 = arith.constant 0.000000e+00 : f32
    %286 = vector.broadcast %cst_90 : f32 to vector<1x128xf32>
    %287 = arith.maximumf %285, %286 : vector<1x128xf32>
    %c9 = arith.constant 9 : index
    %c0_91 = arith.constant 0 : index
    %c0_92 = arith.constant 0 : index
    %288 = vector.load %arg2[%c9, %c0_91, %c0_92] : memref<12x8x24xf32, #tpu.memory_space<vmem>>, vector<1x8x24xf32>
    %289 = vector.shape_cast %288 : vector<1x8x24xf32> to vector<8x24xf32>
    %290 = vector.extract_strided_slice %289 {offsets = [0, 0], sizes = [1, 2], strides = [1, 1]} : vector<8x24xf32> to vector<1x2xf32>
    %c9_93 = arith.constant 9 : index
    %c0_94 = arith.constant 0 : index
    %c0_95 = arith.constant 0 : index
    %291 = vector.load %arg3[%c9_93, %c0_94, %c0_95] : memref<14x8x1xf32, #tpu.memory_space<vmem>>, vector<1x8x1xf32>
    %292 = vector.shape_cast %291 : vector<1x8x1xf32> to vector<8x1xf32>
    %293 = vector.extract_strided_slice %292 {offsets = [0, 0], sizes = [1, 1], strides = [1, 1]} : vector<8x1xf32> to vector<1x1xf32>
    %c2_i32_96 = arith.constant 2 : i32
    %294 = tpu.dynamic_rotate %287 by %c2_i32_96 dim 1 : vector<1x128xf32>, i32 -> vector<1x128xf32>
    %c2_i32_97 = arith.constant 2 : i32
    %295 = vector.broadcast %c2_i32_97 : i32 to vector<1x128xi32>
    %296 = arith.cmpi sge, %2, %295 : vector<1x128xi32>
    %cst_98 = arith.constant 0.000000e+00 : f32
    %297 = vector.broadcast %cst_98 : f32 to vector<1x128xf32>
    %298 = arith.select %296, %294, %297 : vector<1x128xi1>, vector<1x128xf32>
    %299 = vector.extract_strided_slice %290 {offsets = [0, 0], sizes = [1, 1], strides = [1, 1]} : vector<1x2xf32> to vector<1x1xf32>
    %300 = vector.broadcast %299 : vector<1x1xf32> to vector<1x128xf32>
    %301 = arith.mulf %300, %298 : vector<1x128xf32>
    %302 = vector.extract_strided_slice %290 {offsets = [0, 1], sizes = [1, 1], strides = [1, 1]} : vector<1x2xf32> to vector<1x1xf32>
    %303 = vector.broadcast %302 : vector<1x1xf32> to vector<1x128xf32>
    %304 = arith.mulf %303, %287 : vector<1x128xf32>
    %305 = arith.addf %301, %304 : vector<1x128xf32>
    %306 = vector.broadcast %293 : vector<1x1xf32> to vector<1x128xf32>
    %307 = arith.addf %305, %306 : vector<1x128xf32>
    %cst_99 = arith.constant 0.000000e+00 : f32
    %308 = vector.broadcast %cst_99 : f32 to vector<1x128xf32>
    %309 = arith.maximumf %307, %308 : vector<1x128xf32>
    %c10 = arith.constant 10 : index
    %c0_100 = arith.constant 0 : index
    %c0_101 = arith.constant 0 : index
    %310 = vector.load %arg2[%c10, %c0_100, %c0_101] : memref<12x8x24xf32, #tpu.memory_space<vmem>>, vector<1x8x24xf32>
    %311 = vector.shape_cast %310 : vector<1x8x24xf32> to vector<8x24xf32>
    %312 = vector.extract_strided_slice %311 {offsets = [0, 0], sizes = [1, 2], strides = [1, 1]} : vector<8x24xf32> to vector<1x2xf32>
    %c10_102 = arith.constant 10 : index
    %c0_103 = arith.constant 0 : index
    %c0_104 = arith.constant 0 : index
    %313 = vector.load %arg3[%c10_102, %c0_103, %c0_104] : memref<14x8x1xf32, #tpu.memory_space<vmem>>, vector<1x8x1xf32>
    %314 = vector.shape_cast %313 : vector<1x8x1xf32> to vector<8x1xf32>
    %315 = vector.extract_strided_slice %314 {offsets = [0, 0], sizes = [1, 1], strides = [1, 1]} : vector<8x1xf32> to vector<1x1xf32>
    %316 = vector.extract_strided_slice %312 {offsets = [0, 0], sizes = [1, 1], strides = [1, 1]} : vector<1x2xf32> to vector<1x1xf32>
    %317 = vector.extract_strided_slice %251 {offsets = [0, 0], sizes = [1, 128], strides = [1, 1]} : vector<2x128xf32> to vector<1x128xf32>
    %318 = vector.broadcast %316 : vector<1x1xf32> to vector<1x128xf32>
    %319 = arith.mulf %318, %317 : vector<1x128xf32>
    %320 = vector.extract_strided_slice %312 {offsets = [0, 1], sizes = [1, 1], strides = [1, 1]} : vector<1x2xf32> to vector<1x1xf32>
    %321 = vector.extract_strided_slice %251 {offsets = [1, 0], sizes = [1, 128], strides = [1, 1]} : vector<2x128xf32> to vector<1x128xf32>
    %322 = vector.broadcast %320 : vector<1x1xf32> to vector<1x128xf32>
    %323 = arith.mulf %322, %321 : vector<1x128xf32>
    %324 = arith.addf %319, %323 : vector<1x128xf32>
    %325 = vector.broadcast %315 : vector<1x1xf32> to vector<1x128xf32>
    %326 = arith.addf %324, %325 : vector<1x128xf32>
    %327 = arith.addf %309, %326 : vector<1x128xf32>
    %cst_105 = arith.constant 0.000000e+00 : f32
    %328 = vector.broadcast %cst_105 : f32 to vector<1x128xf32>
    %329 = arith.maximumf %327, %328 : vector<1x128xf32>
    %c11 = arith.constant 11 : index
    %c0_106 = arith.constant 0 : index
    %c0_107 = arith.constant 0 : index
    %330 = vector.load %arg2[%c11, %c0_106, %c0_107] : memref<12x8x24xf32, #tpu.memory_space<vmem>>, vector<1x8x24xf32>
    %331 = vector.shape_cast %330 : vector<1x8x24xf32> to vector<8x24xf32>
    %332 = vector.extract_strided_slice %331 {offsets = [0, 0], sizes = [8, 1], strides = [1, 1]} : vector<8x24xf32> to vector<8x1xf32>
    %c11_108 = arith.constant 11 : index
    %c0_109 = arith.constant 0 : index
    %c0_110 = arith.constant 0 : index
    %333 = vector.load %arg3[%c11_108, %c0_109, %c0_110] : memref<14x8x1xf32, #tpu.memory_space<vmem>>, vector<1x8x1xf32>
    %334 = vector.shape_cast %333 : vector<1x8x1xf32> to vector<8x1xf32>
    %335 = vector.broadcast %332 : vector<8x1xf32> to vector<8x128xf32>
    %336 = vector.broadcast %329 : vector<1x128xf32> to vector<8x128xf32>
    %337 = arith.mulf %335, %336 : vector<8x128xf32>
    %338 = vector.broadcast %334 : vector<8x1xf32> to vector<8x128xf32>
    %339 = arith.addf %337, %338 : vector<8x128xf32>
    %cst_111 = arith.constant 0.000000e+00 : f32
    %340 = vector.broadcast %cst_111 : f32 to vector<8x128xf32>
    %341 = arith.maximumf %339, %340 : vector<8x128xf32>
    %c12 = arith.constant 12 : index
    %c0_112 = arith.constant 0 : index
    %c0_113 = arith.constant 0 : index
    %342 = vector.load %arg3[%c12, %c0_112, %c0_113] : memref<14x8x1xf32, #tpu.memory_space<vmem>>, vector<1x8x1xf32>
    %343 = vector.shape_cast %342 : vector<1x8x1xf32> to vector<8x1xf32>
    %c13 = arith.constant 13 : index
    %c0_114 = arith.constant 0 : index
    %c0_115 = arith.constant 0 : index
    %344 = vector.load %arg3[%c13, %c0_114, %c0_115] : memref<14x8x1xf32, #tpu.memory_space<vmem>>, vector<1x8x1xf32>
    %345 = vector.shape_cast %344 : vector<1x8x1xf32> to vector<8x1xf32>
    %346 = arith.addf %102, %341 : vector<8x128xf32>
    %347 = vector.broadcast %343 : vector<8x1xf32> to vector<8x128xf32>
    %348 = arith.mulf %346, %347 : vector<8x128xf32>
    %349 = vector.broadcast %345 : vector<8x1xf32> to vector<8x128xf32>
    %350 = arith.addf %348, %349 : vector<8x128xf32>
    %cst_116 = arith.constant 3.000000e+00 : f32
    %351 = vector.broadcast %cst_116 : f32 to vector<8x128xf32>
    %352 = arith.addf %350, %351 : vector<8x128xf32>
    %cst_117 = arith.constant 0.000000e+00 : f32
    %cst_118 = arith.constant 6.000000e+00 : f32
    %353 = vector.broadcast %cst_117 : f32 to vector<8x128xf32>
    %354 = arith.maximumf %353, %352 : vector<8x128xf32>
    %355 = vector.broadcast %cst_118 : f32 to vector<8x128xf32>
    %356 = arith.minimumf %355, %354 : vector<8x128xf32>
    %357 = arith.mulf %350, %356 : vector<8x128xf32>
    %cst_119 = arith.constant 0.166666672 : f32
    %358 = vector.broadcast %cst_119 : f32 to vector<8x128xf32>
    %359 = arith.mulf %357, %358 : vector<8x128xf32>
    %360 = arith.addf %359, %1 : vector<8x128xf32>
    %c0_120 = arith.constant 0 : index
    %c0_121 = arith.constant 0 : index
    %c0_122 = arith.constant 0 : index
    %361 = vector.load %arg4[%c0_120, %c0_121, %c0_122] : memref<1x8x128xf32, #tpu.memory_space<vmem>>, vector<1x8x128xf32>
    %362 = vector.shape_cast %361 : vector<1x8x128xf32> to vector<8x128xf32>
    %363 = vector.shape_cast %360 : vector<8x128xf32> to vector<1x8x128xf32>
    tpu.vector_store %arg4[%c0_120, %c0_121, %c0_122], %363 {strides = array<i32>} : memref<1x8x128xf32, #tpu.memory_space<vmem>>, vector<1x8x128xf32>,
    return
  }
  func.func @transform_0(%arg0: i32) -> (i32, i32, i32) {
    %c0_i32 = arith.constant 0 : i32
    %c0_i32_0 = arith.constant 0 : i32
    %c0_i32_1 = arith.constant 0 : i32
    return %arg0, %c0_i32, %c0_i32_0 : i32, i32, i32
  }
  func.func @transform_1(%arg0: i32) -> (i32, i32, i32) {
    %c0_i32 = arith.constant 0 : i32
    %c0_i32_0 = arith.constant 0 : i32
    %c0_i32_1 = arith.constant 0 : i32
    %c0_i32_2 = arith.constant 0 : i32
    return %c0_i32, %c0_i32_0, %c0_i32_1 : i32, i32, i32
  }
  func.func @transform_2(%arg0: i32) -> (i32, i32, i32) {
    %c0_i32 = arith.constant 0 : i32
    %c0_i32_0 = arith.constant 0 : i32
    %c0_i32_1 = arith.constant 0 : i32
    %c0_i32_2 = arith.constant 0 : i32
    return %c0_i32, %c0_i32_0, %c0_i32_1 : i32, i32, i32
  }
  func.func @transform_3(%arg0: i32) -> (i32, i32, i32) {
    %c0_i32 = arith.constant 0 : i32
    %c0_i32_0 = arith.constant 0 : i32
    %c0_i32_1 = arith.constant 0 : i32
    return %arg0, %c0_i32, %c0_i32_0 : i32, i32, i32
  }
}

</mosaic_0001>

<bundles_post_ra>
// kernel: tpu_custom_call.1
= control target key start
LH: loop header
LB: loop body
LE: loop exit
PB: predicated region body
PF: predicated region fallthrough
CT: control target
= control target key end

     0   :  { %8 = vsyncpa [#allocation3], 0  ;;  %s1781_s0 = inlined_call_operand.vmem [shape: f32[2,8,128], index: 0, kind: input, shape index: {}]   ;;  %s1782_s1 = inlined_call_operand.vmem [shape: f32[12,8,24], index: 1, kind: input, shape index: {}]   ;;  %s1783_s2 = inlined_call_operand.vmem [shape: f32[14,8,1], index: 2, kind: input, shape index: {}]   ;;  %s1784_s3 = inlined_call_operand.hbm [shape: f32[2,8,128], index: 3, kind: output, shape index: {}]  }
   0x1   :  { %10 = vsyncpa [#allocation3 + $0x1], 0  ;;  %s1460_s12 = smov 0   ;;  %s1462_s13 = smov 0  }
   0x2   :  { %s1464_s14 = smov 0   ;;  %s1466_s15 = smov 0  }
   0x3 LB: > { %s1481_s16 = sadd.s32 4294967295, %s1422_s15   ;;  %s1173_s17 = sadd.s32 4294967294, %s1422_s15   ;;  %s1422_s15 = sphi %s1466_s15, %s1790_s15   ;;  %s1418_s14 = sphi %s1464_s14, %s1789_s14   ;;  %s1414_s13 = sphi %s1462_s13, %s1788_s13   ;;  %s1410_s12 = sphi %s1460_s12, %s1787_s12  }
   0x4   : > { %s1485_s18 = sadd.s32 1, %s1422_s15   ;;  %s91_s19 = sadd.s32 1, %s1418_s14 }
   0x5   : > { %s88_s20 = ssub.s32 %s1422_s15, %s1485_s18  ;;  %p101_p0 = scmp.ne.s32.totalorder %s1418_s14, %s1414_s13 }
   0x6   : > { %p89_p1 = scmp.eq.s32.totalorder %s88_s20, 0  ;;  %p102_p2 = scmp.eq.s32.totalorder %s1481_s16, 1 }
   0x7   : > { %p107_p3 = scmp.ne.s32.totalorder %s1414_s13, %s1410_s12  ;;  %p108_p4 = scmp.eq.s32.totalorder %s1173_s17, 1 }
   0x8   : > { %s1496_s21 = scalar_select %p89_p1, %s1418_s14, %s91_s19  }
   0x9   : > { %p1498_p5 = por %p102_p2, %p101_p0  ;;  %p1502_p6 = por %p108_p4, %p107_p3 }
   0xa   : > { %p1176_p7 = scmp.ge.s32.totalorder %s1422_s15, 1  ;;  %p139_p8 = scmp.lt.s32.totalorder %s1422_s15, 3 }
   0xc   : > { %p140_p9 = pnand %p1176_p7, %p139_p8 }
   0xd   : > { %p162_p10 = scmp.lt.s32.totalorder (!%p140_p9), %s1481_s16, 1  ;;  %s1427_s6 = smov (!%p140_p9), 1  }
   0xe   : > { %143 = sbr.rel (%p140_p9) target bundleno = 1781 (0x6f5), region = 32  ;;  %s1428_s7 = smov (!%p140_p9), 127  }
   0xf   : > { %s1432_s4 = smov (!%p140_p9), 124   ;;  %s1433_s5 = smov (!%p140_p9), 120  }
  0x10   : > { %s1438_s25 = smov (!%p140_p9), 2   ;;  %s1218_s9 = sshll.u32 (!%p140_p9), %s1481_s16, 7 }
  0x11   : > { %s1112_s20 = scalar_lea.hbm (!%p140_p9), %s1784_s3, %s1218_s9 }
  0x13   : > { %v1424_v0 = vmov 0.0   ;;  %vm1425_vm0 = vmmov 0   ;;  %v170_v1 = vld [vmem:[%s1783_s2] sm:$0xff]  ;;  %s163_s26 = scalar_select %p162_p10, %s1481_s16, 1  ;;  %v1426_v2 = vmov 0   ;;  %vm176_vm1 = vcmask 64512  }
  0x14   : > { %1239 = vmatprep.subr.mxu0 %v1424_v0  ;;  %1241 = vmatprep.mubr.msk.f32.mxu0 %vm1425_vm0, %v1424_v0  ;;  %v169_v3 = vld [vmem:[%s1782_s1] sm:$0xff]  ;;  %v1181_v10 = vld [vmem:[%s1783_s2 + $0x8] sm:$0xff]  ;;  %v167_v11 = vlaneseq  ;;  %vm272_vm4 = vcmask 195584   ;;  %v1186_v26 = vld [vmem:[%s1783_s2 + $0x10] sm:$0xff]  ;;  %v1429_v29 = vmov 1   ;;  %v1430_v30 = vmov 3  }
  0x15   : > { %1336 = vset.pattern.permute.xlu0 %v1426_v2  ;;  %1244 = vmatprep.subr.mxu1 %v1424_v0  ;;  %s1178_s27 = sshll.u32 %s163_s26, 3  ;;  %v1180_v14 = vld [vmem:[%s1782_s1 + $0x8] sm:$0xff]  ;;  %v1199_v27 = vld [vmem:[%s1783_s2 + $0x20] sm:$0xff]  ;;  %v1431_v31 = vmov 6   ;;  %v1185_v33 = vld [vmem:[%s1782_s1 + $0x10] sm:$0xff]  ;;  %vm457_vm5 = vcmask 1043456  }
  0x16   : > { %173 = vperm.xlu0 %1336, %v170_v1   ;;  %1250 = vmatprep.mubr.msk.f32.mxu1 %vm1425_vm0, %v1424_v0  ;;  %s165_s30 = scalar_lea.vmem %s1781_s0, %s1178_s27  ;;  %v1540_v12 = vand.u32 127, %v167_v11  ;;  %v1572_v28 = vld [vmem:[%s1782_s1 + $0x28] sm:$0xff]  ;;  %v1190_v35 = vld [vmem:[%s1782_s1 + $0x18] sm:$0xff]  ;;  %vm454_vm6 = vcmask 31744   ;;  %v1203_v46 = vld [vmem:[%s1782_s1 + $0x30] sm:$0xff]  ;;  %v1434_v48 = vmov 2  }
  0x17   : > { %1337 = vset.pattern.permute.xlu1 %v1426_v2  ;;  %v1527_v4 = vld [vmem:[%s165_s30] sm:$0xff]  ;;  %v1616_v47 = vld [vmem:[%s1782_s1 + $0x38] sm:$0xff]  ;;  %v1435_v53 = vmov 4   ;;  %v787_v56 = vshrl.u32 %v167_v11, 7  ;;  %s1439_s26 = smov [#allocation2]  }
  0x18   : > { %1240 = vmatpush3.msra.mxu0 %v1527_v4  ;;  %vm263_vm2 = vcmp.lt.s32.totalorder %v1540_v12, 127  ;;  %vm257_vm3 = vcmp.ge.s32.totalorder %v1540_v12, 1  ;;  %v1198_v51 = vld [vmem:[%s1782_s1 + $0x20] sm:$0xff]  ;;  %vm964_vm7 = vcmp.ge.s32.totalorder %v1540_v12, 2 }
  0x19   : > { %1242 = vmatmul.mubr.msk.f32.vlgmr.msra.gmra.mxu0 %vm176_vm1, %v169_v3  ;;  %1253 = vmatprep.subr.mxu0 %v1424_v0  ;;  %v807_v60 = vsub.s32 2, %v787_v56  ;;  %v817_v61 = vsub.s32 3, %v787_v56  ;;  %v1436_v3 = vmov 5   ;;  %v1665_v11 = vsub.s32 1, %v787_v56 }
  0x1a   : > { %1259 = vmatprep.mubr.msk.f32.mxu0 %vm1425_vm0, %v1424_v0 }
  0x91   : > { %v174_v5 = vpop.permute.xlu0 %173 }
  0xd9   : > { %v246_v6 = vpop.f32.mrf.mxu0 }
  0xda   : > { %v247_v7 = vadd.f32 %v246_v6, %v174_v5  ;;  %v1437_v5 = vmov 7   ;;  %v1202_v6 = vld [vmem:[%s1783_s2 + $0x28] sm:$0xff] }
  0xdb   : > { %v1243_v8 = vpop.f32.mrf.mxu0 }
  0xdc   : > { %v250_v9 = vmax.f32 %v247_v7, 0.0  ;;  %v1206_v7 = vld [vmem:[%s1783_s2 + $0x38] sm:$0xff] }
  0xde   : > { %255 = vrot.lane.b32.xlu1 %v250_v9, %s1427_s6  ;;  %261 = vrot.lane.b32.xlu0 %v250_v9, %s1428_s7 }
  0xe2   : > { %269 = vperm.xlu1 %1337, %v1181_v10   ;;  %v1663_v10 = vsub.s32 0, %v787_v56 }
 0x150   : > { %v262_v13 = vpop.permute.xlu0 %261  ;;  %v256_v15 = vpop.permute.xlu1 %255 }
 0x151   : > { %1245 = vmatpush3.msk.msra.mxu1 %vm263_vm2, %v262_v13 }
 0x152   : > { %1246 = vmatprep.subr.mxu1 %v1424_v0 }
 0x153   : > { %1247 = vmatpush3.msra.mxu1 %v250_v9 }
 0x154   : > { %1248 = vmatprep.subr.mxu1 %v1424_v0 }
 0x155   : > { %1249 = vmatpush3.msk.msra.mxu1 %vm257_vm3, %v256_v15 }
 0x156   : > { %1251 = vmatmul.mubr.msk.f32.vlgmr.msra.gmra.mxu1 %vm272_vm4, %v1180_v14  ;;  %1262 = vmatprep.subr.mxu1 %v1424_v0 }
 0x157   : > { %1264 = vmatprep.mubr.msk.f32.mxu1 %vm1425_vm0, %v1424_v0 }
 0x15d   : > { %v270_v16 = vpop.permute.xlu1 %269 }
 0x216   : > { %v342_v17 = vpop.f32.mrf.mxu1 }
 0x217   : > { %v343_v18 = vadd.f32 %v342_v17, %v270_v16 }
 0x218   : > { %v1252_v19 = vpop.f32.mrf.mxu1 }
 0x219   : > { %v346_v20 = vmax.f32 %v343_v18, 0.0 }
 0x21b   : > { %v347_v21 = vadd.f32 3.0, %v346_v20 }
 0x21d   : > { %v348_v22 = vmax.f32 %v347_v21, 0.0 }
 0x21f   : > { %v349_v23 = vmin.f32 %v348_v22, 6.0 }
 0x221   : > { %v350_v24 = vmul.f32 %v349_v23, %v346_v20 }
 0x223   : > { %v1557_v25 = vmul.f32 0.16666667, %v350_v24 }
 0x225   : > { %356 = vrot.lane.b32.xlu1 %v1557_v25, %s1427_s6  ;;  %359 = vrot.lane.b32.xlu0 %v1557_v25, %s1428_s7 }
 0x229   : > { %364 = vperm.xlu0 %1336, %v1186_v26  }
 0x22d   : > { %697 = vperm.xlu0 %1336, %v1199_v27  }
 0x231   : > { %1338 = vset.pattern.permute.xlu0 %v1429_v29 }
 0x232   : > { %792 = vperm.xlu0 %1338, %v1572_v28  }
 0x236   : > { %1340 = vset.pattern.permute.xlu0 %v1430_v30 }
 0x237   : > { %812 = vperm.xlu0 %1340, %v1572_v28  }
 0x23b   : > { %1343 = vset.pattern.permute.xlu0 %v1431_v31 }
 0x23c   : > { %842 = vperm.xlu0 %1343, %v1572_v28  }
 0x240   : > { %1346 = vset.pattern.permute.xlu0 %v1429_v29 }
 0x241   : > { %452 = vrot.lane.b32.xlu0 %v1190_v35, %s1432_s4 }
 0x245   : > { %606 = vrot.lane.b32.xlu0 %v1190_v35, %s1433_s5  ;;  %s159_s5 = sand.u32 1, %s1414_s13  }
 0x246   : > { %s1177_s8 = sshll.u32 %s159_s5, 3  ;;  %s1101_s24 = scalar_lea.sflag [#allocation3], %s159_s5 }
 0x247   : > { %s161_s10 = scalar_lea.vmem [#allocation2], %s1177_s8 }
 0x248   : > { %s1114_s11 = sshll.u32 %s161_s10, 4  ;;  %s1115_s11 = int_to_ptr.vmem [resolvable:$true] %s1114_s11 }
 0x249   : > { %886 = vperm.xlu0 %1346, %v1203_v46  }
 0x24d   : > { %1348 = vset.pattern.permute.xlu0 %v1426_v2 }
 0x24e   : > { %928 = vperm.xlu0 %1348, %v1616_v47  }
 0x252   : > { %1351 = vset.pattern.permute.xlu0 %v1434_v48 }
 0x253   : > { %939 = vperm.xlu0 %1351, %v1616_v47  }
 0x257   : > { %1353 = vset.pattern.permute.xlu0 %v1426_v2 }
 0x258   : > { %952 = vperm.xlu0 %1353, %v1206_v7  }
 0x25c   : > { %1356 = vset.pattern.permute.xlu0 %v1430_v30 }
 0x297   : > { %v360_v32 = vpop.permute.xlu0 %359  ;;  %v357_v34 = vpop.permute.xlu1 %356 }
 0x298   : > { %1254 = vmatpush3.msk.msra.mxu0 %vm263_vm2, %v360_v32 }
 0x299   : > { %1255 = vmatprep.subr.mxu0 %v1424_v0 }
 0x29a   : > { %1256 = vmatpush3.msra.mxu0 %v1557_v25 }
 0x29b   : > { %1257 = vmatprep.subr.mxu0 %v1424_v0 }
 0x29c   : > { %1258 = vmatpush3.msk.msra.mxu0 %vm257_vm3, %v357_v34 }
 0x29d   : > { %1260 = vmatmul.mubr.msk.f32.vlgmr.msra.gmra.mxu0 %vm272_vm4, %v1185_v33  ;;  %1267 = vmatprep.subr.mxu0 %v1424_v0 }
 0x29e   : > { %1269 = vmatprep.mubr.msk.f32.mxu0 %vm1425_vm0, %v1424_v0 }
 0x2a4   : > { %v365_v36 = vpop.permute.xlu0 %364 }
 0x2a8   : > { %v698_v37 = vpop.permute.xlu0 %697 }
 0x2ad   : > { %v1597_v38 = vpop.permute.xlu0 %792 }
 0x2b2   : > { %v1599_v39 = vpop.permute.xlu0 %812 }
 0x2b7   : > { %v1601_v40 = vpop.permute.xlu0 %842 }
 0x2bb   : > { %v453_v45 = vpop.permute.xlu0 %452 }
 0x35d   : > { %v436_v41 = vpop.f32.mrf.mxu0 }
 0x35e   : > { %v437_v42 = vadd.f32 %v436_v41, %v365_v36 }
 0x35f   : > { %v1261_v43 = vpop.f32.mrf.mxu0 }
 0x360   : > { %v440_v44 = vmax.f32 %v437_v42, 0.0  ;;  %v607_v42 = vpop.permute.xlu0 %606 }
 0x362   : > { %445 = vrot.lane.b32.xlu1 %v440_v44, %s1427_s6  ;;  %1263 = vmatpush3.msk.msra.mxu1 %vm457_vm5, %v440_v44 }
 0x363   : > { %1265 = vmatmul.mubr.msk.f32.vlgmr.msra.gmra.mxu1 %vm454_vm6, %v453_v45  ;;  %1272 = vmatprep.subr.mxu1 %v1424_v0 }
 0x364   : > { %1274 = vmatprep.mubr.msk.f32.mxu1 %vm1425_vm0, %v1424_v0 }
 0x366   : > { %783 = vperm.xlu1 %1337, %v1572_v28  }
 0x36a   : > { %1339 = vset.pattern.permute.xlu1 %v1434_v48 }
 0x36b   : > { %802 = vperm.xlu1 %1339, %v1572_v28  }
 0x36f   : > { %1341 = vset.pattern.permute.xlu1 %v1435_v53 }
 0x3d4   : > { %v446_v49 = vpop.permute.xlu1 %445 }
 0x3d5   : > { %v447_v50 = vsel %vm257_vm3, %v446_v49, 0.0  ;;  %v887_v49 = vpop.permute.xlu0 %886 }
 0x3d6   : > { %1268 = vmatpush3.msk.msra.mxu0 %vm457_vm5, %v447_v50  ;;  %v1204_v50 = vld [vmem:[%s1783_s2 + $0x30] sm:$0xff] }
 0x3d7   : > { %1270 = vmatmul.mubr.msk.f32.vlgmr.msra.gmra.mxu0 %vm454_vm6, %v1190_v35  ;;  %1277 = vmatprep.subr.mxu0 %v1424_v0 }
 0x3d8   : > { %1278 = vmatpush3.msra.mxu0 %v1557_v25  ;;  %1279 = vmatprep.mubr.msk.f32.mxu0 %vm1425_vm0, %v1424_v0 }
 0x3db   : > { %1280 = vmatmul.mubr.msk.f32.vlgmr.msra.gmra.mxu0 %vm176_vm1, %v1198_v51  ;;  %v929_v51 = vpop.permute.xlu0 %928 }
 0x3df   : > { %v940_v56 = vpop.permute.xlu0 %939 }
 0x3e1   : > { %v784_v8 = vpop.permute.xlu1 %783 }
 0x3e6   : > { %v803_v9 = vpop.permute.xlu1 %802 }
 0x423   : > { %v1637_v52 = vpop.f32.mrf.mxu1 }
 0x425   : > { %v1266_v54 = vpop.f32.mrf.mxu1 }
 0x426   : > { %v1207_v54 = vld [vmem:[%s1782_s1 + $0x40] sm:$0xff] }
 0x497   : > { %v1639_v55 = vpop.f32.mrf.mxu0 }
 0x499   : > { %v1271_v57 = vpop.f32.mrf.mxu0 }
 0x49b   : > { %v769_v58 = vpop.f32.mrf.mxu0 }
 0x49c   : > { %v770_v59 = vadd.f32 %v769_v58, %v698_v37 }
 0x49d   : > { %v1281_v62 = vpop.f32.mrf.mxu0 }
 0x49e   : > { %v773_v63 = vmax.f32 %v770_v59, 0.0  ;;  %v1208_v62 = vld [vmem:[%s1783_s2 + $0x40] sm:$0xff] }
 0x4a0   : > { %778 = vrot.lane.b32.xlu1 %v773_v63, %s1427_s6  ;;  %v1643_v0 = vrot.slane %v773_v63, %v807_v60  ;;  %v1645_v1 = vrot.slane %v773_v63, %v817_v61  ;;  %v828_v23 = vrot.slane %v773_v63, %v1663_v10 }
 0x4a2   : > { %v849_v34 = vmul.f32 %v1643_v0, %v1601_v40  ;;  %v931_v58 = vmul.f32 %v929_v51, %v828_v23 }
 0x4a4   : > { %822 = vperm.xlu1 %1341, %v1572_v28  }
 0x4a8   : > { %1342 = vset.pattern.permute.xlu1 %v1436_v3  ;;  %v1213_v3 = vld [vmem:[%s1782_s1 + $0x58] sm:$0xff] }
 0x4a9   : > { %832 = vperm.xlu1 %1342, %v1572_v28  }
 0x4ad   : > { %1344 = vset.pattern.permute.xlu1 %v1437_v5  ;;  %v1191_v5 = vld [vmem:[%s1783_s2 + $0x18] sm:$0xff] }
 0x4ae   : > { %852 = vperm.xlu1 %1344, %v1572_v28  }
 0x4b2   : > { %1345 = vset.pattern.permute.xlu1 %v1426_v2 }
 0x4b3   : > { %863 = vperm.xlu1 %1345, %v1202_v6  }
 0x4b7   : > { %448 = vrot.lane.b32.xlu1 %v440_v44, %s1428_s7  ;;  %s1366_s7 = sshll.u32 %s1439_s26, 4  ;;  %s1367_s7 = int_to_ptr.vmem [resolvable:$false] %s1366_s7 }
 0x4b8   : > { %s1368_s16 = scalar_lea.vmem %s1367_s7, 256  ;;  %p1369_p0 = scmp.lt.s32.totalorder %s1115_s11, %s1367_s7 }
 0x4bb   : > { %877 = vperm.xlu1 %1345, %v1203_v46  }
 0x4bf   : > { %1347 = vset.pattern.permute.xlu1 %v1434_v48 }
 0x4c0   : > { %896 = vperm.xlu1 %1347, %v1203_v46  }
 0x4c4   : > { %1349 = vset.pattern.permute.xlu1 %v1429_v29 }
 0x4c5   : > { %933 = vperm.xlu1 %1349, %v1616_v47  }
 0x4c9   : > { %1350 = vset.pattern.permute.xlu1 %v1430_v30  ;;  %v838_v30 = vrot.slane %v773_v63, %v1665_v11  ;;  %v1209_v63 = vld [vmem:[%s1782_s1 + $0x48] sm:$0xff] }
 0x4ca   : > { %906 = vperm.xlu1 %1350, %v1203_v46  }
 0x512   : > { %v779_v13 = vpop.permute.xlu1 %778 }
 0x513   : > { %v780_v14 = vsel %vm257_vm3, %v779_v13, 0.0 }
 0x514   : > { %v789_v15 = vrot.slane %v780_v14, %v1663_v10  ;;  %v798_v16 = vrot.slane %v780_v14, %v1665_v11  ;;  %v808_v19 = vrot.slane %v780_v14, %v807_v60  ;;  %v818_v22 = vrot.slane %v780_v14, %v817_v61 }
 0x516   : > { %v790_v17 = vmul.f32 %v789_v15, %v784_v8  ;;  %v799_v18 = vmul.f32 %v798_v16, %v1597_v38  ;;  %v809_v21 = vmul.f32 %v808_v19, %v803_v9  ;;  %v819_v26 = vmul.f32 %v818_v22, %v1599_v39 }
 0x518   : > { %v800_v20 = vadd.f32 %v799_v18, %v790_v17 }
 0x51a   : > { %v810_v24 = vadd.f32 %v809_v21, %v800_v20 }
 0x51c   : > { %v820_v28 = vadd.f32 %v819_v26, %v810_v24  ;;  %v953_v26 = vpop.permute.xlu0 %952 }
 0x51f   : > { %v823_v25 = vpop.permute.xlu1 %822 }
 0x520   : > { %v829_v27 = vmul.f32 %v828_v23, %v823_v25 }
 0x522   : > { %v830_v32 = vadd.f32 %v829_v27, %v820_v28 }
 0x524   : > { %v833_v31 = vpop.permute.xlu1 %832 }
 0x525   : > { %v839_v33 = vmul.f32 %v838_v30, %v833_v31 }
 0x527   : > { %v840_v35 = vadd.f32 %v839_v33, %v830_v32 }
 0x529   : > { %v853_v36 = vpop.permute.xlu1 %852  ;;  %v850_v37 = vadd.f32 %v849_v34, %v840_v35 }
 0x52a   : > { %v859_v38 = vmul.f32 %v1645_v1, %v853_v36 }
 0x52c   : > { %v860_v41 = vadd.f32 %v859_v38, %v850_v37 }
 0x52e   : > { %v864_v43 = vpop.permute.xlu1 %863 }
 0x52f   : > { %v866_v44 = vadd.f32 %v864_v43, %v860_v41 }
 0x531   : > { %v867_v39 = vmax.f32 %v866_v44, 0.0 }
 0x532   : > { %v449_v45 = vpop.permute.xlu1 %448 }
 0x533   : > { %v450_v46 = vsel %vm263_vm2, %v449_v45, 0.0  ;;  %872 = vrot.lane.b32.xlu1 %v867_v39, %s1427_s6  ;;  %v902_v16 = vrot.slane %v867_v39, %v1663_v10  ;;  %v912_v19 = vrot.slane %v867_v39, %v1665_v11 }
 0x534   : > { %1273 = vmatpush3.msk.msra.mxu1 %vm457_vm5, %v450_v46 }
 0x535   : > { %1275 = vmatmul.mubr.msk.f32.vlgmr.msra.gmra.mxu1 %vm454_vm6, %v607_v42 }
 0x536   : > { %v878_v40 = vpop.permute.xlu1 %877 }
 0x537   : > { %945 = vperm.xlu1 %1350, %v1616_v47   ;;  %v942_v47 = vmul.f32 %v940_v56, %v1643_v0  ;;  %v1211_v0 = vld [vmem:[%s1782_s1 + $0x50] sm:$0xff]  ;;  %v1214_v56 = vld [vmem:[%s1783_s2 + $0x58] sm:$0xff] }
 0x53b   : > { %v897_v53 = vpop.permute.xlu1 %896  ;;  %1352 = vset.pattern.permute.xlu1 %v1426_v2 }
 0x53c   : > { %917 = vperm.xlu1 %1352, %v1204_v50   ;;  %v903_v18 = vmul.f32 %v902_v16, %v897_v53 }
 0x540   : > { %v934_v57 = vpop.permute.xlu1 %933  ;;  %970 = vperm.xlu1 %1352, %v1207_v54  }
 0x541   : > { %v936_v59 = vmul.f32 %v934_v57, %v838_v30  ;;  %v1216_v57 = vld [vmem:[%s1783_s2 + $0x68] sm:$0xff] }
 0x543   : > { %v937_v60 = vadd.f32 %v936_v59, %v931_v58 }
 0x544   : > { %1354 = vset.pattern.permute.xlu1 %v1429_v29 }
 0x545   : > { %975 = vperm.xlu1 %1354, %v1207_v54   ;;  %v943_v61 = vadd.f32 %v942_v47, %v937_v60  ;;  %v907_v6 = vpop.permute.xlu1 %906 }
 0x546   : > { %v913_v23 = vmul.f32 %v912_v19, %v907_v6 }
 0x549   : > { %1355 = vset.pattern.permute.xlu1 %v1434_v48  ;;  %v1210_v48 = vld [vmem:[%s1783_s2 + $0x48] sm:$0xff] }
 0x54a   : > { %984 = vperm.xlu1 %1355, %v1207_v54  }
 0x54e   : > { %1357 = vset.pattern.permute.xlu1 %v1426_v2 }
 0x54f   : > { %1000 = vperm.xlu1 %1357, %v1208_v62  }
 0x553   : > { %1014 = vperm.xlu1 %1357, %v1209_v63  }
 0x557   : > { %1037 = vperm.xlu1 %1357, %v1211_v0  }
 0x55b   : > { %1359 = vset.pattern.permute.xlu1 %v1429_v29 }
 0x55c   : > { %1042 = vperm.xlu1 %1359, %v1211_v0  }
 0x560   : > { %1360 = vset.pattern.permute.xlu1 %v1426_v2 }
 0x561   : > { %1026 = vperm.xlu1 %1360, %v1210_v48  }
 0x565   : > { %1061 = vperm.xlu1 %1360, %v1213_v3  }
 0x569   : > { %686 = vperm.xlu1 %1360, %v1191_v5  }
 0x5a5   : > { %v873_v7 = vpop.permute.xlu1 %872 }
 0x5a6   : > { %v874_v8 = vsel %vm257_vm3, %v873_v7, 0.0 }
 0x5a7   : > { %v883_v9 = vrot.slane %v874_v8, %v1663_v10  ;;  %v892_v13 = vrot.slane %v874_v8, %v1665_v11  ;;  %v603_v11 = vadd.f32 %v1639_v55, %v1637_v52 }
 0x5a9   : > { %v884_v14 = vmul.f32 %v883_v9, %v878_v40  ;;  %v893_v15 = vmul.f32 %v892_v13, %v887_v49 }
 0x5ab   : > { %v894_v17 = vadd.f32 %v893_v15, %v884_v14 }
 0x5ad   : > { %v904_v21 = vadd.f32 %v903_v18, %v894_v17 }
 0x5af   : > { %v914_v25 = vadd.f32 %v913_v23, %v904_v21 }
 0x5b2   : > { %v946_v20 = vpop.permute.xlu1 %945 }
 0x5b3   : > { %v948_v22 = vmul.f32 %v946_v20, %v1645_v1  ;;  %v1215_v1 = vld [vmem:[%s1783_s2 + $0x60] sm:$0xff] }
 0x5b4   : > { %1083 = vperm.xlu1 %1360, %v1215_v1  }
 0x5b5   : > { %v949_v24 = vadd.f32 %v948_v22, %v943_v61 }
 0x5b7   : > { %v918_v27 = vpop.permute.xlu1 %917  ;;  %v955_v30 = vadd.f32 %v953_v26, %v949_v24 }
 0x5b8   : > { %v920_v28 = vadd.f32 %v918_v27, %v914_v25 }
 0x5ba   : > { %v921_v31 = vmax.f32 %v920_v28, 0.0 }
 0x5bb   : > { %v971_v37 = vpop.permute.xlu1 %970 }
 0x5bc   : > { %v956_v32 = vadd.f32 %v955_v30, %v921_v31 }
 0x5be   : > { %v957_v33 = vmax.f32 %v956_v32, 0.0 }
 0x5c0   : > { %962 = vrot.lane.b32.xlu0 %v957_v33, %s1438_s25  ;;  %v976_v42 = vpop.permute.xlu1 %975  ;;  %v994_v46 = vrot.slane %v957_v33, 1 }
 0x5c4   : > { %990 = vperm.xlu0 %1356, %v1207_v54   ;;  %v1212_v54 = vld [vmem:[%s1783_s2 + $0x50] sm:$0xff] }
 0x5c5   : > { %v985_v39 = vpop.permute.xlu1 %984 }
 0x5c8   : > { %1358 = vset.pattern.permute.xlu0 %v1429_v29 }
 0x5c9   : > { %1019 = vperm.xlu0 %1358, %v1209_v63  }
 0x5ca   : > { %v1001_v50 = vpop.permute.xlu1 %1000 }
 0x5cd   : > { %1361 = vset.pattern.permute.xlu0 %v1426_v2  ;;  %v987_v2 = vmul.f32 %v985_v39, %v957_v33 }
 0x5ce   : > { %v1015_v58 = vpop.permute.xlu1 %1014 }
 0x5d2   : > { %v1038_v47 = vpop.permute.xlu1 %1037 }
 0x5d3   : > { %v1040_v6 = vmul.f32 %v1038_v47, %v957_v33 }
 0x5d7   : > { %v1043_v63 = vpop.permute.xlu1 %1042 }
 0x5d8   : > { %v1045_v5 = vmul.f32 %v1043_v63, %v994_v46 }
 0x5da   : > { %v1046_v8 = vadd.f32 %v1045_v5, %v1040_v6 }
 0x5dc   : > { %v1027_v3 = vpop.permute.xlu1 %1026 }
 0x5e0   : > { %v1062_v9 = vpop.permute.xlu1 %1061 }
 0x5e4   : > { %v687_v18 = vpop.permute.xlu1 %686 }
 0x5f5   : > { %v679_v34 = vpop.f32.mrf.mxu1 }
 0x5f6   : > { %v683_v35 = vadd.f32 %v679_v34, %v603_v11 }
 0x5f7   : > { %v1276_v36 = vpop.f32.mrf.mxu1 }
 0x5f8   : > { %v689_v19 = vadd.f32 %v687_v18, %v683_v35 }
 0x5fa   : > { %v690_v23 = vmax.f32 %v689_v19, 0.0 }
 0x62f   : > { %v1084_v26 = vpop.permute.xlu1 %1083 }
 0x632   : > { %v963_v38 = vpop.permute.xlu0 %962 }
 0x633   : > { %v967_v29 = vsel %vm964_vm7, %v963_v38, 0.0 }
 0x634   : > { %v979_v41 = vrot.slane %v967_v29, 1  ;;  %v973_v44 = vmul.f32 %v971_v37, %v967_v29 }
 0x636   : > { %v981_v43 = vmul.f32 %v979_v41, %v976_v42 }
 0x638   : > { %v982_v45 = vadd.f32 %v981_v43, %v973_v44 }
 0x63a   : > { %v988_v52 = vadd.f32 %v987_v2, %v982_v45 }
 0x63f   : > { %v991_v49 = vpop.permute.xlu0 %990 }
 0x640   : > { %v996_v55 = vmul.f32 %v994_v46, %v991_v49 }
 0x642   : > { %v997_v40 = vadd.f32 %v996_v55, %v988_v52 }
 0x644   : > { %v1003_v51 = vadd.f32 %v1001_v50, %v997_v40  ;;  %v1020_v59 = vpop.permute.xlu0 %1019 }
 0x646   : > { %v1004_v53 = vmax.f32 %v1003_v51, 0.0 }
 0x648   : > { %1009 = vrot.lane.b32.xlu0 %v1004_v53, %s1438_s25  ;;  %v1022_v0 = vmul.f32 %v1020_v59, %v1004_v53  ;;  %s1362_s25 = scalar_lea.vmem %s1115_s11, 128 }
 0x649   : > { %p1363_p11 = scmp.ne.s32.totalorder %s1115_s11, %s1362_s25  ;;  %p1370_p1 = scmp.lt.s32.totalorder %s1368_s16, %s1362_s25 }
 0x64b   : > { %p1364_p12 = pnand %p1363_p11, %p1498_p5  ;;  %p1371_p2 = por %p1370_p1, %p1369_p0 }
 0x64c   : > { %1049 = vperm.xlu0 %1361, %v1212_v54  }
 0x64d   : > { %p1365_p13 = pneg %p1364_p12 }
 0x64f   : > { %p1372_p3 = pnand %p1371_p2, %p1365_p13 }
 0x650   : > { %1071 = vperm.xlu0 %1361, %v1214_v56  }
 0x654   : > { %1089 = vperm.xlu0 %1361, %v1216_v57  }
 0x6ba   : > { %v1010_v60 = vpop.permute.xlu0 %1009 }
 0x6bb   : > { %v1011_v61 = vsel %vm964_vm7, %v1010_v60, 0.0 }
 0x6bc   : > { %v1017_v62 = vmul.f32 %v1015_v58, %v1011_v61 }
 0x6be   : > { %v1023_v48 = vadd.f32 %v1022_v0, %v1017_v62 }
 0x6c0   : > { %v1029_v7 = vadd.f32 %v1027_v3, %v1023_v48 }
 0x6c2   : > { %v1030_v14 = vmax.f32 %v1029_v7, 0.0 }
 0x6c7   : > { %v1050_v13 = vpop.permute.xlu0 %1049 }
 0x6c8   : > { %v1052_v15 = vadd.f32 %v1050_v13, %v1046_v8 }
 0x6ca   : > { %v1053_v16 = vadd.f32 %v1052_v15, %v1030_v14 }
 0x6cb   : > { %v1072_v21 = vpop.permute.xlu0 %1071 }
 0x6cc   : > { %v1054_v17 = vmax.f32 %v1053_v16, 0.0 }
 0x6ce   : > { %v1067_v12 = vrot.slane %v1054_v17, %v1663_v10 }
 0x6cf   : > { %v1090_v28 = vpop.permute.xlu0 %1089 }
 0x6d0   : > { %v1068_v20 = vmul.f32 %v1067_v12, %v1062_v9 }
 0x6d2   : > { %v1074_v22 = vadd.f32 %v1072_v21, %v1068_v20 }
 0x6d4   : > { %v1075_v24 = vmax.f32 %v1074_v22, 0.0 }
 0x6d6   : > { %v1080_v25 = vadd.f32 %v1075_v24, %v690_v23 }
 0x6d8   : > { %v1086_v27 = vmul.f32 %v1084_v26, %v1080_v25 }
 0x6da   : > { %v1092_v30 = vadd.f32 %v1090_v28, %v1086_v27 }
 0x6dc   : > { %v1093_v31 = vadd.f32 3.0, %v1092_v30 }
 0x6de   : > { %v1094_v32 = vmax.f32 %v1093_v31, 0.0 }
 0x6e0   : > { %v1095_v33 = vmin.f32 %v1094_v32, 6.0 }
 0x6e2   : > { %v1096_v1 = vmul.f32 %v1095_v33, %v1092_v30 }
 0x6e4   : > { %v1097_v10 = vmul.f32 0.16666667, %v1096_v1 }
 0x6e6   : > { %v1098_v11 = vadd.f32 %v1097_v10, %v1527_v4 }
 0x6e8   : > { %1099 = vst [vmem:[%s161_s10] sm:$0xff] %v1098_v11 }
 0x6e9   : > { %1375 = shalt.err (!%p1372_p3)
}
 0x6ea   : > { %s1376_s27 = scalar_lea.hbm %s1112_s20, 128  ;;  %s1380_s6 = scalar_lea.hbm %s1784_s3, 256 }
 0x6eb   : > { %p1377_p4 = scmp.ne.s32.totalorder %s1112_s20, %s1376_s27  ;;  %p1381_p9 = scmp.lt.s32.totalorder %s1112_s20, %s1784_s3 }
 0x6ec   : > { %p1382_p10 = scmp.lt.s32.totalorder %s1380_s6, %s1376_s27 }
 0x6ed   : > { %p1378_p7 = pnand %p1377_p4, %p1498_p5 }
 0x6ee   : > { %p1383_p11 = por %p1382_p10, %p1381_p9 }
 0x6ef   : > { %p1379_p8 = pneg %p1378_p7 }
 0x6f1   : > { %p1384_p12 = pnand %p1383_p11, %p1379_p8 }
 0x6f3   : > { %1387 = shalt.err (!%p1384_p12)
}
 0x6f4   : > { %1282 = dma.vmem_to_hbm [thread:$0]  (%p1498_p5), %s1115_s11, 128, %s1112_s20, %s1101_s24  }
 0x6f5 PF: > { %p1288_p13 = scmp.ge.s32.totalorder %s1422_s15, 2  ;;  %s1126_s5 = sand.u32 1, %s1410_s12  }
 0x6f6   : > { %s1127_s8 = scalar_lea.sflag [#allocation3], %s1126_s5 }
 0x6f7   : > { %p1285_p0 = pnand %p1288_p13, %p1502_p6 }
 0x6f9   : > { %p1286_p1 = pneg %p1285_p0 }
 0x6fb   : > { %1405 = dma.done.wait (%p1286_p1), %s1127_s8, 128  }
 0x6fc   : > { %1407 = vsyncadd (%p1286_p1), %s1127_s8, 4294967168  ;;  %p13_p2 = scmp.ge.s32.totalorder %s1485_s18, 4   ;;  %s1787_s12 = smov %s1414_s13 }
 0x6fd   : > { %s1788_s13 = smov %s1418_s14  ;;  %s1789_s14 = smov %s1496_s21 }
 0x6fe   : > { %s1790_s15 = smov %s1485_s18  ;;  %15 = sbr.rel (!%p13_p2) target bundleno = 3 (0x3), region = 91 }
 0x703   :  { %1132 = vsyncpa [#allocation3], 1 }
 0x704   :  { %1134 = vsyncpa [#allocation3 + $0x1], 1 }

</bundles_post_ra>
